<compile_context>
chip_gen: v6e
topology: v6e:2x2x1
jax: 0.10.0
libtpu: 0.0.40
codegen_flags: <defaults>
</compile_context>

<pallas_src>
import functools

import numpy as np
import jax
import jax.numpy as jnp
from jax import lax
from jax.experimental import pallas as pl
from jax.experimental.pallas import tpu as pltpu

LANE = 128  # TPU lane width


def _round_up(n, m):
    return ((n + m - 1) // m) * m


def lmser_kernel(layer_num, reflect, x_ref, *rest):
    """Whole LMSER forward (reflect iterations of encode+decode) on one batch tile.

    Refs: x, enc_w[0..L-1], dec_w[0..L-1], x_out, y_out.
    The reflect recurrence runs as a lax.fori_loop (carry = x + recurrent tuple) with the
    last iteration peeled for the output writes; layer loops are unrolled Python loops.
    """
    enc_refs = rest[:layer_num]                    # enc_refs[j]: (in_p[j], out_p[j])
    dec_refs = rest[layer_num:2 * layer_num]       # dec_refs[j]: (out_p[j], in_p[j]) == enc.T
    x_out_ref = rest[2 * layer_num]
    y_out_ref = rest[2 * layer_num + 1]

    def one_reflect(x, recurrent):
        # ---- encoder sweep ----
        short_cut = []
        for j in range(layer_num):
            w = enc_refs[j][...]                   # read at point of use (streams to MXU)
            h = jnp.dot((x + recurrent[j]).astype(w.dtype), w,
                        preferred_element_type=jnp.float32)
            if j != layer_num - 1:
                h = jax.nn.sigmoid(h)              # elementwise stays f32 (v5e-safe)
            x = h
            short_cut.append(x)
        y = x                                      # classification logits of this iteration
        # ---- decoder sweep (DCW tied: dec_refs[l] is fc[l].weight, pre-transposed) ----
        new_rec = []
        for j in range(layer_num):
            l = layer_num - j - 1
            w = dec_refs[l][...]
            h = jnp.dot((x + short_cut[l]).astype(w.dtype), w,
                        preferred_element_type=jnp.float32)
            if j != layer_num - 1:
                h = jax.nn.sigmoid(h)
            x = h
            new_rec.append(x)
        return x, tuple(new_rec[::-1]), y

    tile_b = x_ref.shape[0]
    x = x_ref[...].astype(jnp.float32)
    # recurrent[j] has shape (tile_b, in_p[j]); zeros reproduce PyTorch's scalar-0 first pass.
    recurrent = tuple(jnp.zeros((tile_b, enc_refs[j].shape[0]), jnp.float32)
                      for j in range(layer_num))

    if reflect > 1:
        def body(_, carry):
            x_c, rec_c = carry[0], carry[1:]
            x_n, rec_n, _ = one_reflect(x_c, rec_c)
            return (x_n,) + rec_n
        carry = lax.fori_loop(0, reflect - 1, body, (x,) + recurrent)
        x, recurrent = carry[0], carry[1:]

    # Final (peeled) reflect iteration: its encoder output is y, decoder output is x_out.
    x, _, y = one_reflect(x, recurrent)
    y_out_ref[...] = y.astype(y_out_ref.dtype)     # padded logit columns are exactly 0
    x_out_ref[...] = x.astype(x_out_ref.dtype)     # final reconstruction


def _choose_tile_b(batch, max_tile_b):
    bp8 = _round_up(batch, 8)
    tile = min(max_tile_b, bp8)
    # With a single-tile grid, dimension_semantics=("parallel",) has nothing to shard and
    # one of v7x's two TensorCores idles.  Split into two tiles when the half stays a
    # multiple of 8 (>= 8 rows still fills MXU rows reasonably).
    if tile >= bp8 and bp8 >= 16 and (bp8 // 2) % 8 == 0:
        tile = bp8 // 2
    return tile


def lmser_forward(x, enc_ws, reflect, class_num, *,
                  max_tile_b=512, compute_dtype=jnp.bfloat16,
                  out_dtype=None, interpret=False):
    """Pad to lane-aligned shapes, tile the batch, run the kernel, slice padding off.

    compute_dtype: MXU input dtype for weights and dot operands (default bf16; pass None
                   to keep the weight dtype).  Accumulation / elementwise math is f32.
    out_dtype:     dtype of x_out / y_out HBM writeback (default x.dtype; bf16 halves
                   writeback traffic on v5e when downstream tolerates it).
    """
    layer_num = len(enc_ws)
    batch, in_dim = x.shape
    out_dtype = x.dtype if out_dtype is None else out_dtype

    # ---- pad every weight dim up to a multiple of 128 with zeros (see invariant above) ----
    enc_p, dec_p = [], []
    for w in enc_ws:
        r, c = w.shape
        wp = jnp.pad(w, ((0, _round_up(r, LANE) - r), (0, _round_up(c, LANE) - c)))
        if compute_dtype is not None:
            wp = wp.astype(compute_dtype)
        enc_p.append(wp)
        dec_p.append(wp.T)        # one-time host-side transpose; no per-reflect vxpose in-kernel
    in_dim_p = enc_p[0].shape[0]
    class_p = enc_p[-1].shape[1]

    # ---- pad / tile the batch (the M dim of every matmul) ----
    tile_b = _choose_tile_b(batch, max_tile_b)
    batch_p = _round_up(batch, tile_b)
    x_p = jnp.pad(x, ((0, batch_p - batch), (0, in_dim_p - in_dim)))
    grid = (batch_p // tile_b,)

    x_spec = pl.BlockSpec((tile_b, in_dim_p), lambda b: (b, 0))
    # Weight block index never changes across the grid -> Pallas keeps them resident and
    # does not re-DMA per tile.
    # TODO(synk): if VMEM ever gets tight (v7x: 64 MiB physical / 32 MiB scoped), switch
    # these to pipeline_mode=pl.Buffered(1) (or a one-shot VMEM scratch copy) to drop the
    # unused second pipeline buffer.
    w_specs = [pl.BlockSpec(w.shape, lambda b: (0, 0)) for w in enc_p + dec_p]
    out_specs = [pl.BlockSpec((tile_b, in_dim_p), lambda b: (b, 0)),
                 pl.BlockSpec((tile_b, class_p), lambda b: (b, 0))]
    out_shape = (jax.ShapeDtypeStruct((batch_p, in_dim_p), out_dtype),
                 jax.ShapeDtypeStruct((batch_p, class_p), out_dtype))

    # ---- advisory cost estimate: reflect * (encoder + decoder) matmuls + sigmoids ----
    flops = 0
    transcendentals = 0
    for j, w in enumerate(enc_p):
        r, c = w.shape
        flops += 2 * 2 * batch_p * r * c            # enc + dec matmul for this layer
        if j != layer_num - 1:
            transcendentals += batch_p * c          # encoder sigmoid
        if j != 0:
            transcendentals += batch_p * r          # decoder sigmoid (layers l = 1..L-1)
    flops *= reflect
    transcendentals *= reflect
    obytes = jnp.dtype(out_dtype).itemsize
    bytes_accessed = (x_p.size * x_p.dtype.itemsize
                      + sum(w.size * w.dtype.itemsize for w in enc_p + dec_p)
                      + batch_p * in_dim_p * obytes
                      + batch_p * class_p * obytes)

    kernel = functools.partial(lmser_kernel, layer_num, reflect)
    x_out_p, y_out_p = pl.pallas_call(
        kernel,
        out_shape=out_shape,
        grid_spec=pltpu.PrefetchScalarGridSpec(
            num_scalar_prefetch=0,
            grid=grid,
            in_specs=[x_spec] + w_specs,
            out_specs=out_specs,
        ),
        # Batch tiles are independent -> shard across TensorCores (v7x) and double-buffer
        # the per-tile x DMA.  Per-step VMEM is ~1-2 MiB even at tile_b=512, well inside
        # the default scoped limit on every generation.
        compiler_params=pltpu.CompilerParams(dimension_semantics=("parallel",)),
        cost_estimate=pl.CostEstimate(flops=int(flops),
                                      transcendentals=int(transcendentals),
                                      bytes_accessed=int(bytes_accessed)),
        interpret=interpret,
    )(x_p, *enc_p, *dec_p)

    # Slice off batch / feature / class padding before anything downstream (softmax/argmax).
    return x_out_p[:batch, :in_dim], y_out_p[:batch, :class_num]


def reference_forward(x, enc_ws, reflect, compute_dtype=None):
    """Pure-JAX mirror of the PyTorch forward (unpadded weights).

    If compute_dtype is given, dot operands are cast to it (matching the kernel's MXU
    input dtype) while accumulation stays f32.
    """
    def mm(a, w):
        if compute_dtype is not None:
            a = a.astype(compute_dtype)
            w = w.astype(compute_dtype)
        return jnp.dot(a, w, preferred_element_type=jnp.float32)

    layer_num = len(enc_ws)
    recurrent = [0.0] * layer_num
    y = None
    for i in range(reflect):
        short_cut = []
        for j in range(layer_num):
            h = mm(x + recurrent[j], enc_ws[j])
            if j != layer_num - 1:
                h = jax.nn.sigmoid(h)
            x = h
            short_cut.append(x)
        if i == reflect - 1:
            y = x
        new_rec = []
        for j in range(layer_num):
            l = layer_num - j - 1
            h = mm(x + short_cut[l], enc_ws[l].T)   # DCW tying: dec_fc[l](z) == z @ fc[l].weight
            if j != layer_num - 1:
                h = jax.nn.sigmoid(h)
            x = h
            new_rec.append(x)
        recurrent = new_rec[::-1]
    return x, y


def build_params(key, class_num, layer_num, channel, img_size):
    """Deterministic DCW-tied weights; returns enc_ws[j] of shape (in_c, out_c)."""
    enc_ws = []
    for i in range(layer_num):
        in_c, out_c = channel, channel
        if i == 0:
            in_c = img_size * img_size
        if i == layer_num - 1:
            out_c = class_num
        key, k1, k2 = jax.random.split(key, 3)
        a = jax.random.normal(k1, (out_c, in_c), jnp.float32) * 0.05  # fc[i].weight init
        b = jax.random.normal(k2, (in_c, out_c), jnp.float32) * 0.05  # dec_fc[i].weight init
        w = (a + b.T) / 2.0                  # tied fc[i].weight, shape (out_c, in_c)
        enc_ws.append(w.T)                   # (in_c, out_c)
    return enc_ws


if __name__ == "__main__":
    # Small shapes consistent with the module; batch=128 splits into two 64-row tiles so
    # both TensorCores get work on v7x while every matmul still has a healthy M dim.
    class_num, reflect_num, layer_num = 10, 3, 3
    channel, img_size, batch = 32, 16, 128

    key = jax.random.PRNGKey(0)
    key, kx = jax.random.split(key)
    x = jax.random.normal(kx, (batch, img_size * img_size), jnp.float32)

    enc_ws = build_params(key, class_num, layer_num, channel, img_size)

    # Default path: bf16 MXU inputs, f32 elementwise/accumulation, f32 outputs.
    x_out, y_out = lmser_forward(x, enc_ws, reflect_num, class_num)
    jax.block_until_ready((x_out, y_out))

    # Tight check against a reference that quantizes dot inputs the same way (bf16).
    x_ref_bf, y_ref_bf = reference_forward(x, enc_ws, reflect_num,
                                           compute_dtype=jnp.bfloat16)
    np.testing.assert_allclose(np.asarray(x_out), np.asarray(x_ref_bf), rtol=2e-2, atol=2e-2)
    np.testing.assert_allclose(np.asarray(y_out), np.asarray(y_ref_bf), rtol=2e-2, atol=2e-2)

    # Looser sanity check against the pure-f32 reference (bounds bf16 compounding error
    # through the reflect recurrence at reflect_num=3).
    x_ref, y_ref = reference_forward(x, enc_ws, reflect_num)
    np.testing.assert_allclose(np.asarray(x_out), np.asarray(x_ref), rtol=5e-2, atol=5e-2)
    np.testing.assert_allclose(np.asarray(y_out), np.asarray(y_ref), rtol=5e-2, atol=5e-2)

    assert x_out.shape == (batch, img_size * img_size)
    assert y_out.shape == (batch, class_num)

    print("KERNEL_OK")
</pallas_src>

<mosaic_0001>
module attributes {stable_mosaic.version = 11 : i64} {
  func.func @lmser_kernel(%arg0: i32, %arg1: memref<64x256xf32, #tpu.memory_space<vmem>>, %arg2: memref<256x128xbf16, #tpu.memory_space<vmem>>, %arg3: memref<128x128xbf16, #tpu.memory_space<vmem>>, %arg4: memref<128x128xbf16, #tpu.memory_space<vmem>>, %arg5: memref<128x256xbf16, #tpu.memory_space<vmem>>, %arg6: memref<128x128xbf16, #tpu.memory_space<vmem>>, %arg7: memref<128x128xbf16, #tpu.memory_space<vmem>>, %arg8: memref<64x256xf32, #tpu.memory_space<vmem>>, %arg9: memref<64x128xf32, #tpu.memory_space<vmem>>) attributes {dimension_semantics = [#tpu.dimension_semantics<parallel>], iteration_bounds = array<i64: 2>, scalar_prefetch = 0 : i64, scratch_operands = 0 : i64, tpu.core_type = #tpu.core_type<tc>, window_params = [{transform_indices = @transform_0, window_bounds = array<i64: 64, 256>}, {pipeline_mode = #tpu.pipeline_mode<synchronous>, transform_indices = @transform_1, window_bounds = array<i64: 256, 128>}, {pipeline_mode = #tpu.pipeline_mode<synchronous>, transform_indices = @transform_2, window_bounds = array<i64: 128, 128>}, {pipeline_mode = #tpu.pipeline_mode<synchronous>, transform_indices = @transform_3, window_bounds = array<i64: 128, 128>}, {pipeline_mode = #tpu.pipeline_mode<synchronous>, transform_indices = @transform_4, window_bounds = array<i64: 128, 256>}, {pipeline_mode = #tpu.pipeline_mode<synchronous>, transform_indices = @transform_5, window_bounds = array<i64: 128, 128>}, {pipeline_mode = #tpu.pipeline_mode<synchronous>, transform_indices = @transform_6, window_bounds = array<i64: 128, 128>}, {transform_indices = @transform_7, window_bounds = array<i64: 64, 256>}, {transform_indices = @transform_8, window_bounds = array<i64: 64, 128>}]} {
    %c0 = arith.constant 0 : index
    %c0_0 = arith.constant 0 : index
    %0 = vector.load %arg1[%c0, %c0_0] : memref<64x256xf32, #tpu.memory_space<vmem>>, vector<64x256xf32>
    %cst = arith.constant 0.000000e+00 : f32
    %1 = vector.broadcast %cst : f32 to vector<64x256xf32>
    %cst_1 = arith.constant 0.000000e+00 : f32
    %2 = vector.broadcast %cst_1 : f32 to vector<64x128xf32>
    %cst_2 = arith.constant 0.000000e+00 : f32
    %3 = vector.broadcast %cst_2 : f32 to vector<64x128xf32>
    %c0_i32 = arith.constant 0 : i32
    %c2_i32 = arith.constant 2 : i32
    %4 = arith.addi %c0_i32, %c2_i32 : i32
    %c1_i32 = arith.constant 1 : i32
    %5:4 = scf.for %arg10 = %c0_i32 to %4 step %c1_i32 iter_args(%arg11 = %0, %arg12 = %1, %arg13 = %2, %arg14 = %3) -> (vector<64x256xf32>, vector<64x256xf32>, vector<64x128xf32>, vector<64x128xf32>)  : i32 {
      %c0_29 = arith.constant 0 : index
      %c0_30 = arith.constant 0 : index
      %52 = vector.load %arg2[%c0_29, %c0_30] : memref<256x128xbf16, #tpu.memory_space<vmem>>, vector<256x128xbf16>
      %53 = arith.addf %arg11, %arg12 : vector<64x256xf32>
      %54 = arith.truncf %53 : vector<64x256xf32> to vector<64x256xbf16>
      %cst_31 = arith.constant dense<0.000000e+00> : vector<64x128xf32>
      %55 = tpu.matmul %54, %52, %cst_31 {dimension_numbers = #tpu.dot_dimension_numbers<[1], [0], [0], [1], [0, 0, 1, 1], [], []>} : vector<64x256xbf16>, vector<256x128xbf16>, vector<64x128xf32> -> vector<64x128xf32>
      %56 = arith.negf %55 : vector<64x128xf32>
      %57 = math.exp %56 : vector<64x128xf32>
      %cst_32 = arith.constant 1.000000e+00 : f32
      %58 = vector.broadcast %cst_32 : f32 to vector<64x128xf32>
      %59 = arith.addf %58, %57 : vector<64x128xf32>
      %60 = arith.divf %58, %59 : vector<64x128xf32>
      %c0_33 = arith.constant 0 : index
      %c0_34 = arith.constant 0 : index
      %61 = vector.load %arg3[%c0_33, %c0_34] : memref<128x128xbf16, #tpu.memory_space<vmem>>, vector<128x128xbf16>
      %62 = arith.addf %60, %arg13 : vector<64x128xf32>
      %63 = arith.truncf %62 : vector<64x128xf32> to vector<64x128xbf16>
      %cst_35 = arith.constant dense<0.000000e+00> : vector<64x128xf32>
      %64 = tpu.matmul %63, %61, %cst_35 {dimension_numbers = #tpu.dot_dimension_numbers<[1], [0], [0], [1], [0, 0, 1, 1], [], []>} : vector<64x128xbf16>, vector<128x128xbf16>, vector<64x128xf32> -> vector<64x128xf32>
      %65 = arith.negf %64 : vector<64x128xf32>
      %66 = math.exp %65 : vector<64x128xf32>
      %cst_36 = arith.constant 1.000000e+00 : f32
      %67 = vector.broadcast %cst_36 : f32 to vector<64x128xf32>
      %68 = arith.addf %67, %66 : vector<64x128xf32>
      %69 = arith.divf %67, %68 : vector<64x128xf32>
      %c0_37 = arith.constant 0 : index
      %c0_38 = arith.constant 0 : index
      %70 = vector.load %arg4[%c0_37, %c0_38] : memref<128x128xbf16, #tpu.memory_space<vmem>>, vector<128x128xbf16>
      %71 = arith.addf %69, %arg14 : vector<64x128xf32>
      %72 = arith.truncf %71 : vector<64x128xf32> to vector<64x128xbf16>
      %cst_39 = arith.constant dense<0.000000e+00> : vector<64x128xf32>
      %73 = tpu.matmul %72, %70, %cst_39 {dimension_numbers = #tpu.dot_dimension_numbers<[1], [0], [0], [1], [0, 0, 1, 1], [], []>} : vector<64x128xbf16>, vector<128x128xbf16>, vector<64x128xf32> -> vector<64x128xf32>
      %c0_40 = arith.constant 0 : index
      %c0_41 = arith.constant 0 : index
      %74 = vector.load %arg7[%c0_40, %c0_41] : memref<128x128xbf16, #tpu.memory_space<vmem>>, vector<128x128xbf16>
      %75 = arith.addf %73, %73 : vector<64x128xf32>
      %76 = arith.truncf %75 : vector<64x128xf32> to vector<64x128xbf16>
      %cst_42 = arith.constant dense<0.000000e+00> : vector<64x128xf32>
      %77 = tpu.matmul %76, %74, %cst_42 {dimension_numbers = #tpu.dot_dimension_numbers<[1], [0], [0], [1], [0, 0, 1, 1], [], []>} : vector<64x128xbf16>, vector<128x128xbf16>, vector<64x128xf32> -> vector<64x128xf32>
      %78 = arith.negf %77 : vector<64x128xf32>
      %79 = math.exp %78 : vector<64x128xf32>
      %cst_43 = arith.constant 1.000000e+00 : f32
      %80 = vector.broadcast %cst_43 : f32 to vector<64x128xf32>
      %81 = arith.addf %80, %79 : vector<64x128xf32>
      %82 = arith.divf %80, %81 : vector<64x128xf32>
      %c0_44 = arith.constant 0 : index
      %c0_45 = arith.constant 0 : index
      %83 = vector.load %arg6[%c0_44, %c0_45] : memref<128x128xbf16, #tpu.memory_space<vmem>>, vector<128x128xbf16>
      %84 = arith.addf %82, %69 : vector<64x128xf32>
      %85 = arith.truncf %84 : vector<64x128xf32> to vector<64x128xbf16>
      %cst_46 = arith.constant dense<0.000000e+00> : vector<64x128xf32>
      %86 = tpu.matmul %85, %83, %cst_46 {dimension_numbers = #tpu.dot_dimension_numbers<[1], [0], [0], [1], [0, 0, 1, 1], [], []>} : vector<64x128xbf16>, vector<128x128xbf16>, vector<64x128xf32> -> vector<64x128xf32>
      %87 = arith.negf %86 : vector<64x128xf32>
      %88 = math.exp %87 : vector<64x128xf32>
      %cst_47 = arith.constant 1.000000e+00 : f32
      %89 = vector.broadcast %cst_47 : f32 to vector<64x128xf32>
      %90 = arith.addf %89, %88 : vector<64x128xf32>
      %91 = arith.divf %89, %90 : vector<64x128xf32>
      %c0_48 = arith.constant 0 : index
      %c0_49 = arith.constant 0 : index
      %92 = vector.load %arg5[%c0_48, %c0_49] : memref<128x256xbf16, #tpu.memory_space<vmem>>, vector<128x256xbf16>
      %93 = arith.addf %91, %60 : vector<64x128xf32>
      %94 = arith.truncf %93 : vector<64x128xf32> to vector<64x128xbf16>
      %cst_50 = arith.constant dense<0.000000e+00> : vector<64x256xf32>
      %95 = tpu.matmul %94, %92, %cst_50 {dimension_numbers = #tpu.dot_dimension_numbers<[1], [0], [0], [1], [0, 0, 1, 1], [], []>} : vector<64x128xbf16>, vector<128x256xbf16>, vector<64x256xf32> -> vector<64x256xf32>
      scf.yield %95, %95, %91, %82 : vector<64x256xf32>, vector<64x256xf32>, vector<64x128xf32>, vector<64x128xf32>
    }
    %c0_3 = arith.constant 0 : index
    %c0_4 = arith.constant 0 : index
    %6 = vector.load %arg2[%c0_3, %c0_4] : memref<256x128xbf16, #tpu.memory_space<vmem>>, vector<256x128xbf16>
    %7 = arith.addf %5#0, %5#1 : vector<64x256xf32>
    %8 = arith.truncf %7 : vector<64x256xf32> to vector<64x256xbf16>
    %cst_5 = arith.constant dense<0.000000e+00> : vector<64x128xf32>
    %9 = tpu.matmul %8, %6, %cst_5 {dimension_numbers = #tpu.dot_dimension_numbers<[1], [0], [0], [1], [0, 0, 1, 1], [], []>} : vector<64x256xbf16>, vector<256x128xbf16>, vector<64x128xf32> -> vector<64x128xf32>
    %10 = arith.negf %9 : vector<64x128xf32>
    %11 = math.exp %10 : vector<64x128xf32>
    %cst_6 = arith.constant 1.000000e+00 : f32
    %12 = vector.broadcast %cst_6 : f32 to vector<64x128xf32>
    %13 = arith.addf %12, %11 : vector<64x128xf32>
    %14 = arith.divf %12, %13 : vector<64x128xf32>
    %c0_7 = arith.constant 0 : index
    %c0_8 = arith.constant 0 : index
    %15 = vector.load %arg3[%c0_7, %c0_8] : memref<128x128xbf16, #tpu.memory_space<vmem>>, vector<128x128xbf16>
    %16 = arith.addf %14, %5#2 : vector<64x128xf32>
    %17 = arith.truncf %16 : vector<64x128xf32> to vector<64x128xbf16>
    %cst_9 = arith.constant dense<0.000000e+00> : vector<64x128xf32>
    %18 = tpu.matmul %17, %15, %cst_9 {dimension_numbers = #tpu.dot_dimension_numbers<[1], [0], [0], [1], [0, 0, 1, 1], [], []>} : vector<64x128xbf16>, vector<128x128xbf16>, vector<64x128xf32> -> vector<64x128xf32>
    %19 = arith.negf %18 : vector<64x128xf32>
    %20 = math.exp %19 : vector<64x128xf32>
    %cst_10 = arith.constant 1.000000e+00 : f32
    %21 = vector.broadcast %cst_10 : f32 to vector<64x128xf32>
    %22 = arith.addf %21, %20 : vector<64x128xf32>
    %23 = arith.divf %21, %22 : vector<64x128xf32>
    %c0_11 = arith.constant 0 : index
    %c0_12 = arith.constant 0 : index
    %24 = vector.load %arg4[%c0_11, %c0_12] : memref<128x128xbf16, #tpu.memory_space<vmem>>, vector<128x128xbf16>
    %25 = arith.addf %23, %5#3 : vector<64x128xf32>
    %26 = arith.truncf %25 : vector<64x128xf32> to vector<64x128xbf16>
    %cst_13 = arith.constant dense<0.000000e+00> : vector<64x128xf32>
    %27 = tpu.matmul %26, %24, %cst_13 {dimension_numbers = #tpu.dot_dimension_numbers<[1], [0], [0], [1], [0, 0, 1, 1], [], []>} : vector<64x128xbf16>, vector<128x128xbf16>, vector<64x128xf32> -> vector<64x128xf32>
    %c0_14 = arith.constant 0 : index
    %c0_15 = arith.constant 0 : index
    %28 = vector.load %arg7[%c0_14, %c0_15] : memref<128x128xbf16, #tpu.memory_space<vmem>>, vector<128x128xbf16>
    %29 = arith.addf %27, %27 : vector<64x128xf32>
    %30 = arith.truncf %29 : vector<64x128xf32> to vector<64x128xbf16>
    %cst_16 = arith.constant dense<0.000000e+00> : vector<64x128xf32>
    %31 = tpu.matmul %30, %28, %cst_16 {dimension_numbers = #tpu.dot_dimension_numbers<[1], [0], [0], [1], [0, 0, 1, 1], [], []>} : vector<64x128xbf16>, vector<128x128xbf16>, vector<64x128xf32> -> vector<64x128xf32>
    %32 = arith.negf %31 : vector<64x128xf32>
    %33 = math.exp %32 : vector<64x128xf32>
    %cst_17 = arith.constant 1.000000e+00 : f32
    %34 = vector.broadcast %cst_17 : f32 to vector<64x128xf32>
    %35 = arith.addf %34, %33 : vector<64x128xf32>
    %36 = arith.divf %34, %35 : vector<64x128xf32>
    %c0_18 = arith.constant 0 : index
    %c0_19 = arith.constant 0 : index
    %37 = vector.load %arg6[%c0_18, %c0_19] : memref<128x128xbf16, #tpu.memory_space<vmem>>, vector<128x128xbf16>
    %38 = arith.addf %36, %23 : vector<64x128xf32>
    %39 = arith.truncf %38 : vector<64x128xf32> to vector<64x128xbf16>
    %cst_20 = arith.constant dense<0.000000e+00> : vector<64x128xf32>
    %40 = tpu.matmul %39, %37, %cst_20 {dimension_numbers = #tpu.dot_dimension_numbers<[1], [0], [0], [1], [0, 0, 1, 1], [], []>} : vector<64x128xbf16>, vector<128x128xbf16>, vector<64x128xf32> -> vector<64x128xf32>
    %41 = arith.negf %40 : vector<64x128xf32>
    %42 = math.exp %41 : vector<64x128xf32>
    %cst_21 = arith.constant 1.000000e+00 : f32
    %43 = vector.broadcast %cst_21 : f32 to vector<64x128xf32>
    %44 = arith.addf %43, %42 : vector<64x128xf32>
    %45 = arith.divf %43, %44 : vector<64x128xf32>
    %c0_22 = arith.constant 0 : index
    %c0_23 = arith.constant 0 : index
    %46 = vector.load %arg5[%c0_22, %c0_23] : memref<128x256xbf16, #tpu.memory_space<vmem>>, vector<128x256xbf16>
    %47 = arith.addf %45, %14 : vector<64x128xf32>
    %48 = arith.truncf %47 : vector<64x128xf32> to vector<64x128xbf16>
    %cst_24 = arith.constant dense<0.000000e+00> : vector<64x256xf32>
    %49 = tpu.matmul %48, %46, %cst_24 {dimension_numbers = #tpu.dot_dimension_numbers<[1], [0], [0], [1], [0, 0, 1, 1], [], []>} : vector<64x128xbf16>, vector<128x256xbf16>, vector<64x256xf32> -> vector<64x256xf32>
    %c0_25 = arith.constant 0 : index
    %c0_26 = arith.constant 0 : index
    %50 = vector.load %arg9[%c0_25, %c0_26] : memref<64x128xf32, #tpu.memory_space<vmem>>, vector<64x128xf32>
    tpu.vector_store %arg9[%c0_25, %c0_26], %27 {strides = array<i32>} : memref<64x128xf32, #tpu.memory_space<vmem>>, vector<64x128xf32>,
    %c0_27 = arith.constant 0 : index
    %c0_28 = arith.constant 0 : index
    %51 = vector.load %arg8[%c0_27, %c0_28] : memref<64x256xf32, #tpu.memory_space<vmem>>, vector<64x256xf32>
    tpu.vector_store %arg8[%c0_27, %c0_28], %49 {strides = array<i32>} : memref<64x256xf32, #tpu.memory_space<vmem>>, vector<64x256xf32>,
    return
  }
  func.func @transform_0(%arg0: i32) -> (i32, i32) {
    %c0_i32 = arith.constant 0 : i32
    %c0_i32_0 = arith.constant 0 : i32
    return %arg0, %c0_i32 : i32, i32
  }
  func.func @transform_1(%arg0: i32) -> (i32, i32) {
    %c0_i32 = arith.constant 0 : i32
    %c0_i32_0 = arith.constant 0 : i32
    %c0_i32_1 = arith.constant 0 : i32
    return %c0_i32, %c0_i32_0 : i32, i32
  }
  func.func @transform_2(%arg0: i32) -> (i32, i32) {
    %c0_i32 = arith.constant 0 : i32
    %c0_i32_0 = arith.constant 0 : i32
    %c0_i32_1 = arith.constant 0 : i32
    return %c0_i32, %c0_i32_0 : i32, i32
  }
  func.func @transform_3(%arg0: i32) -> (i32, i32) {
    %c0_i32 = arith.constant 0 : i32
    %c0_i32_0 = arith.constant 0 : i32
    %c0_i32_1 = arith.constant 0 : i32
    return %c0_i32, %c0_i32_0 : i32, i32
  }
  func.func @transform_4(%arg0: i32) -> (i32, i32) {
    %c0_i32 = arith.constant 0 : i32
    %c0_i32_0 = arith.constant 0 : i32
    %c0_i32_1 = arith.constant 0 : i32
    return %c0_i32, %c0_i32_0 : i32, i32
  }
  func.func @transform_5(%arg0: i32) -> (i32, i32) {
    %c0_i32 = arith.constant 0 : i32
    %c0_i32_0 = arith.constant 0 : i32
    %c0_i32_1 = arith.constant 0 : i32
    return %c0_i32, %c0_i32_0 : i32, i32
  }
  func.func @transform_6(%arg0: i32) -> (i32, i32) {
    %c0_i32 = arith.constant 0 : i32
    %c0_i32_0 = arith.constant 0 : i32
    %c0_i32_1 = arith.constant 0 : i32
    return %c0_i32, %c0_i32_0 : i32, i32
  }
  func.func @transform_7(%arg0: i32) -> (i32, i32) {
    %c0_i32 = arith.constant 0 : i32
    %c0_i32_0 = arith.constant 0 : i32
    return %arg0, %c0_i32 : i32, i32
  }
  func.func @transform_8(%arg0: i32) -> (i32, i32) {
    %c0_i32 = arith.constant 0 : i32
    %c0_i32_0 = arith.constant 0 : i32
    return %arg0, %c0_i32 : i32, i32
  }
}

</mosaic_0001>

<bundles_post_ra>
// kernel: tpu_custom_call.1
= control target key start
LH: loop header
LB: loop body
LE: loop exit
PB: predicated region body
PF: predicated region fallthrough
CT: control target
= control target key end

     0   :  { %s6426_s0 = inlined_call_operand.hbm [shape: f32[128,256], index: 0, kind: input, shape index: {}]   ;;  %s6427_s1 = inlined_call_operand.hbm [shape: bf16[256,128], index: 1, kind: input, shape index: {}]   ;;  %s6428_s2 = inlined_call_operand.hbm [shape: bf16[128,128], index: 2, kind: input, shape index: {}]   ;;  %s6429_s3 = inlined_call_operand.hbm [shape: bf16[128,128], index: 3, kind: input, shape index: {}]   ;;  %s6430_s4 = inlined_call_operand.hbm [shape: bf16[128,256], index: 4, kind: input, shape index: {}]   ;;  %s6431_s5 = inlined_call_operand.hbm [shape: bf16[128,128], index: 5, kind: input, shape index: {}]   ;;  %s6432_s6 = inlined_call_operand.hbm [shape: bf16[128,128], index: 6, kind: input, shape index: {}]   ;;  %s6433_s7 = inlined_call_operand.hbm [shape: f32[128,256], index: 7, kind: output, shape index: {0}]   ;;  %s6434_s8 = inlined_call_operand.hbm [shape: f32[128,128], index: 8, kind: output, shape index: {1}]  }
   0x1   :  { %6466 = sst [smem:[#allocation50_spill]] %s6427_s1 }
   0x2   :  { %6467 = sst [smem:[#allocation51_spill]] %s6428_s2 }
   0x3   :  { %14 = vsyncpa [#allocation3], 0 }
   0x4   :  { %16 = vsyncpa [#allocation3 + $0x1], 0 }
   0x5   :  { %17 = vsyncpa [#allocation6], 0 }
   0x6   :  { %18 = vsyncpa [#allocation9], 0 }
   0x7   :  { %19 = vsyncpa [#allocation12], 0 }
   0x8   :  { %20 = vsyncpa [#allocation4], 0 }
   0x9   :  { %22 = vsyncpa [#allocation4 + $0x1], 0 }
   0xa   :  { %23 = vsyncpa [#allocation16], 0 }
   0xb   :  { %25 = vsyncpa [#allocation16 + $0x1], 0  ;;  %s5439_s27 = smov 0   ;;  %s5441_s28 = smov 0  }
   0xc   :  { %s5443_s29 = smov 0   ;;  %s5445_s30 = smov 0  }
   0xd LB: > { %s5373_s9 = smov [#allocation5]   ;;  %s5460_s11 = sadd.s32 4294967295, %s5175_s30   ;;  %s5175_s30 = sphi %s5445_s30, %s6630_s30   ;;  %s5171_s29 = sphi %s5443_s29, %s6629_s29   ;;  %s5167_s28 = sphi %s5441_s28, %s6628_s28   ;;  %s5163_s27 = sphi %s5439_s27, %s6627_s27  }
   0xe   : > { %s252_s10 = sshll.u32 %s5373_s9, 4  ;;  %p3177_p0 = scmp.ge.s32.totalorder %s5175_s30, 1  ;;  %s253_s10 = int_to_ptr.vmem [resolvable:$true] %s252_s10 }
   0xf   : > { %p6435_p1 = scmp.eq.s32.totalorder %s5460_s11, 0  ;;  %p240_p2 = scmp.lt.s32.totalorder %s5175_s30, 3 }
  0x10   : > { %s5374_s13 = smov [#allocation8]   ;;  %s5375_s16 = smov [#allocation11]  }
  0x11   : > { %p5465_p3 = pnand %p3177_p0, %p240_p2  ;;  %s278_s14 = sshll.u32 %s5374_s13, 4  ;;  %s5478_s14 = int_to_ptr.vmem [resolvable:$true] %s278_s14 }
  0x12   : > { %s304_s17 = sshll.u32 %s5375_s16, 4  ;;  %s4700_s19 = scalar_lea.vmem %s253_s10, 2048  ;;  %s5480_s17 = int_to_ptr.vmem [resolvable:$true] %s304_s17 }
  0x13   : > { %s6468_s12 = scalar_select %p5465_p3, 1, 0 }
  0x14   : > { %p3803_p5 = pneg %p5465_p3  ;;  %p4701_p8 = scmp.ne.s32.totalorder %s253_s10, %s4700_s19 }
  0x15   : > { %p4708_p11 = scmp.lt.s32.totalorder %s253_s10, %s253_s10  ;;  %p4709_p12 = scmp.lt.s32.totalorder %s4700_s19, %s4700_s19 }
  0x16   : > { %p5474_p6 = pnand %p3803_p5, %p6435_p1 }
  0x17   : > { %p4710_p13 = por %p4709_p12, %p4708_p11 }
  0x18   : > { %p5484_p7 = pneg %p5474_p6 }
  0x1a   : > { %p4703_p9 = pnand %p4701_p8, %p5484_p7 }
  0x1c   : > { %p4704_p10 = pneg %p4703_p9 }
  0x1e   : > { %p4711_p0 = pnand %p4710_p13, %p4704_p10 }
  0x20   : > { %4714 = shalt.err (!%p4711_p0)
}
  0x21   : > { %s5376_s20 = smov 64   ;;  %s5377_s21 = smov 4  }
  0x22   : > { %s6471_s1 = sld [smem:[#allocation50_spill]]  ;;  %s4726_s24 = scalar_lea.vmem %s5478_s14, 1024 }
  0x23   : > { %p4727_p2 = scmp.ne.s32.totalorder %s5478_s14, %s4726_s24  ;;  %p4734_p9 = scmp.lt.s32.totalorder %s5478_s14, %s5478_s14 }
  0x24   : > { %p4735_p10 = scmp.lt.s32.totalorder %s4726_s24, %s4726_s24 }
  0x25   : > { %p4729_p5 = pnand %p4727_p2, %p5484_p7 }
  0x26   : > { %p4736_p11 = por %p4735_p10, %p4734_p9 }
  0x27   : > { %p4730_p8 = pneg %p4729_p5 }
  0x28   : > { %3806 = dma.hbm_to_vmem [thread:$0]  (!%p5474_p6), %s6471_s1, 2048, %s253_s10, [#allocation6], %s5376_s20, %s5376_s20, %s5377_s21  }
  0x29   : > { %p4737_p12 = pnand %p4736_p11, %p4730_p8 }
  0x2b   : > { %4740 = shalt.err (!%p4737_p12)
}
  0x2c   : > { %3812 = dma.hbm_to_vmem [thread:$0]  (!%p5474_p6), %s6429_s3, 1024, %s5478_s14, [#allocation9], %s5376_s20, %s5376_s20, %s5377_s21  }
  0x2d   : > { %s4752_s9 = scalar_lea.vmem %s5480_s17, 1024  ;;  %p4760_p5 = scmp.lt.s32.totalorder %s5480_s17, %s5480_s17 }
  0x2e   : > { %p4753_p13 = scmp.ne.s32.totalorder %s5480_s17, %s4752_s9  ;;  %p4761_p8 = scmp.lt.s32.totalorder %s4752_s9, %s4752_s9 }
  0x30   : > { %p4755_p0 = pnand %p4753_p13, %p5484_p7  ;;  %p4762_p9 = por %p4761_p8, %p4760_p5 }
  0x32   : > { %p4756_p2 = pneg %p4755_p0 }
  0x34   : > { %p4763_p10 = pnand %p4762_p9, %p4756_p2 }
  0x36   : > { %4766 = shalt.err (!%p4763_p10)
}
  0x37   : > { %3818 = dma.hbm_to_vmem [thread:$0]  (!%p5474_p6), %s6431_s5, 1024, %s5480_s17, [#allocation12], %s5376_s20, %s5376_s20, %s5377_s21  }
  0x38   : > { %s5378_s14 = smov [#allocation7]   ;;  %s5379_s19 = smov [#allocation10]  }
  0x39   : > { %s265_s16 = sshll.u32 %s5378_s14, 4  ;;  %s291_s22 = sshll.u32 %s5379_s19, 4  ;;  %s266_s16 = int_to_ptr.vmem [resolvable:$true] %s265_s16  ;;  %s292_s22 = int_to_ptr.vmem [resolvable:$true] %s291_s22 }
  0x3a   : > { %s4778_s23 = scalar_lea.vmem %s266_s16, 1024  ;;  %p4786_p0 = scmp.lt.s32.totalorder %s266_s16, %s266_s16 }
  0x3b   : > { %p4779_p11 = scmp.ne.s32.totalorder %s266_s16, %s4778_s23  ;;  %p4787_p2 = scmp.lt.s32.totalorder %s4778_s23, %s4778_s23 }
  0x3d   : > { %p4781_p12 = pnand %p4779_p11, %p5484_p7  ;;  %p4788_p5 = por %p4787_p2, %p4786_p0 }
  0x3f   : > { %p4782_p13 = pneg %p4781_p12 }
  0x41   : > { %p4789_p8 = pnand %p4788_p5, %p4782_p13 }
  0x43   : > { %4792 = shalt.err (!%p4789_p8)
}
  0x44   : > { %s6472_s2 = sld [smem:[#allocation51_spill]]  ;;  %s4804_s25 = scalar_lea.vmem %s292_s22, 2048 }
  0x45   : > { %p4805_p9 = scmp.ne.s32.totalorder %s292_s22, %s4804_s25  ;;  %p4812_p12 = scmp.lt.s32.totalorder %s292_s22, %s292_s22 }
  0x46   : > { %p4813_p0 = scmp.lt.s32.totalorder %s4804_s25, %s4804_s25 }
  0x47   : > { %p4807_p10 = pnand %p4805_p9, %p5484_p7 }
  0x48   : > { %p4814_p13 = por %p4813_p0, %p4812_p12 }
  0x49   : > { %p4808_p11 = pneg %p4807_p10 }
  0x4a   : > { %3809 = dma.hbm_to_vmem [thread:$0]  (!%p5474_p6), %s6472_s2, 1024, %s266_s16, [#allocation6], %s5376_s20, %s5376_s20, %s5377_s21  }
  0x4b   : > { %p4815_p2 = pnand %p4814_p13, %p4808_p11 }
  0x4d   : > { %4818 = shalt.err (!%p4815_p2)
}
  0x4e   : > { %s5380_s26 = smov 128   ;;  %s5381_s9 = smov 8  }
  0x4f   : > { %3815 = dma.hbm_to_vmem [thread:$0]  (!%p5474_p6), %s6430_s4, 2048, %s292_s22, [#allocation9], %s5380_s26, %s5380_s26, %s5381_s9  }
  0x50   : > { %s5382_s14 = smov [#allocation13]  }
  0x51   : > { %s317_s16 = sshll.u32 %s5382_s14, 4  ;;  %s318_s16 = int_to_ptr.vmem [resolvable:$true] %s317_s16 }
  0x52   : > { %s4830_s19 = scalar_lea.vmem %s318_s16, 1024  ;;  %p4838_p10 = scmp.lt.s32.totalorder %s318_s16, %s318_s16 }
  0x53   : > { %p4831_p5 = scmp.ne.s32.totalorder %s318_s16, %s4830_s19  ;;  %p4839_p11 = scmp.lt.s32.totalorder %s4830_s19, %s4830_s19 }
  0x55   : > { %p4833_p8 = pnand %p4831_p5, %p5484_p7  ;;  %p4840_p12 = por %p4839_p11, %p4838_p10 }
  0x57   : > { %p4834_p9 = pneg %p4833_p8 }
  0x59   : > { %p4841_p0 = pnand %p4840_p12, %p4834_p9 }
  0x5b   : > { %4844 = shalt.err (!%p4841_p0)
}
  0x5c   : > { %3821 = dma.hbm_to_vmem [thread:$0]  (!%p5474_p6), %s6432_s6, 1024, %s318_s16, [#allocation12], %s5376_s20, %s5376_s20, %s5377_s21  }
  0x5d   : > { %s3176_s15 = sadd.s32 4294967294, %s5175_s30   ;;  %s5557_s18 = sadd.s32 1, %s5175_s30  }
  0x5e   : > { %s35_s17 = ssub.s32 %s5175_s30, %s5557_s18  ;;  %s38_s24 = sadd.s32 1, %s5171_s29 }
  0x5f   : > { %p36_p7 = scmp.eq.s32.totalorder %s35_s17, 0  ;;  %p45_p13 = scmp.ne.s32.totalorder %s5171_s29, %s5167_s28 }
  0x60   : > { %p46_p2 = scmp.eq.s32.totalorder %s5175_s30, 0  ;;  %p51_p5 = scmp.ne.s32.totalorder %s5167_s28, %s5163_s27 }
  0x61   : > { %s5568_s25 = scalar_select %p36_p7, %s5171_s29, %s38_s24  }
  0x62   : > { %p5570_p8 = por %p46_p2, %p45_p13  ;;  %p5576_p6 = por %p6435_p1, %p51_p5 }
  0x63   : > { %p201_p9 = scmp.eq.s32.totalorder %s5460_s11, 1  ;;  %p207_p10 = scmp.eq.s32.totalorder %s3176_s15, 1 }
  0x64   : > { %s6474_s20 = scalar_select %p5576_p6, 1, 0 }
  0x65   : > { %p3839_p11 = scmp.lt.s32.totalorder %s5175_s30, 2  ;;  %s331_s21 = sand.u32 1, %s5171_s29  }
  0x66   : > { %p5583_p12 = por %p201_p9, %p45_p13  ;;  %p5587_p0 = por %p207_p10, %p51_p5 }
  0x67   : > { %s3185_s13 = sshll.u32 %s331_s21, 7  ;;  %s3401_s14 = sshll.u32 %s5175_s30, 11 }
  0x68   : > { %s6475_s9 = scalar_select %p5583_p12, 1, 0 }
  0x69   : > { %s6476_s10 = scalar_select %p5587_p0, 1, 0 }
  0x6a   : > { %s5595_s23 = scalar_lea.hbm %s6426_s0, %s3401_s14  ;;  %s335_s22 = scalar_lea.vmem [#allocation2], %s3185_s13 }
  0x6b   : > { %s343_s15 = sshll.u32 %s335_s22, 4  ;;  %p5601_p7 = pnand %p3839_p11, %p5570_p8  ;;  %s5597_s15 = int_to_ptr.vmem [resolvable:$true] %s343_s15 }
  0x6c   : > { %s5605_s24 = scalar_lea.sflag [#allocation3], %s331_s21  ;;  %s4845_s1 = scalar_lea.hbm %s5595_s23, 2048 }
  0x6d   : > { %p4846_p13 = scmp.ne.s32.totalorder %s5595_s23, %s4845_s1  ;;  %p4847_p2 = pneg %p5601_p7 }
  0x6e   : > { %s4850_s13 = scalar_lea.hbm %s6426_s0, 4096  ;;  %p4851_p8 = scmp.lt.s32.totalorder %s5595_s23, %s6426_s0 }
  0x6f   : > { %p4848_p5 = pnand %p4847_p2, %p4846_p13  ;;  %p4852_p10 = scmp.lt.s32.totalorder %s4850_s13, %s4845_s1 }
  0x71   : > { %p4849_p9 = pneg %p4848_p5  ;;  %p4853_p11 = por %p4852_p10, %p4851_p8 }
  0x73   : > { %p4854_p4 = pnand %p4853_p11, %p4849_p9 }
  0x75   : > { %4857 = shalt.err (!%p4854_p4)
}
  0x76   : > { %s4858_s26 = scalar_lea.vmem %s5597_s15, 2048  ;;  %s5383_s21 = smov [#allocation2]  }
  0x77   : > { %p4859_p1 = scmp.ne.s32.totalorder %s5597_s15, %s4858_s26  ;;  %s4863_s2 = sshll.u32 %s5383_s21, 4  ;;  %s4864_s2 = int_to_ptr.vmem [resolvable:$false] %s4863_s2 }
  0x78   : > { %s4865_s14 = scalar_lea.vmem %s4864_s2, 4096  ;;  %p4866_p5 = scmp.lt.s32.totalorder %s5597_s15, %s4864_s2 }
  0x79   : > { %p4861_p0 = pnand %p4859_p1, %p4847_p2  ;;  %p4867_p12 = scmp.lt.s32.totalorder %s4865_s14, %s4858_s26 }
  0x7b   : > { %p4862_p13 = pneg %p4861_p0  ;;  %p4868_p6 = por %p4867_p12, %p4866_p5 }
  0x7d   : > { %p4869_p3 = pnand %p4868_p6, %p4862_p13 }
  0x7f   : > { %4872 = shalt.err (!%p4869_p3)
}
  0x80   : > { %s5384_s1 = smov 256   ;;  %s5385_s16 = smov 16  }
  0x81   : > { %3825 = dma.hbm_to_vmem [thread:$0]  (!%p5601_p7), %s5595_s23, 2048, %s5597_s15, %s5605_s24, %s5384_s1, %s5384_s1, %s5385_s16  }
  0x82   : > { %p6478_p1 = scmp.ne.s32.totalorder %s6468_s12, 0 }
  0x84   : > { %355 = sbr.rel (%p6478_p1) target bundleno = 3000 (0xbb8), region = 48 }
  0x89   : > { %s5629_s13 = sand.u32 1, %s5167_s28   ;;  %p6479_p3 = scmp.ne.s32.totalorder %s6474_s20, 0 }
  0x8a   : > { %s3190_s2 = sshll.u32 %s5629_s13, 7  ;;  %s358_s19 = scalar_lea.sflag [#allocation3], %s5629_s13 }
  0x8b   : > { %s361_s22 = scalar_lea.vmem [#allocation2], %s3190_s2 }
  0x8c   : > { %5138 = dma.done.wait (%p6479_p3), %s358_s19, 2048  }
  0x8d   : > { %5140 = vsyncadd (%p6479_p3), %s358_s19, 4294965248  ;;  %p6480_p4 = scmp.eq.s32.totalorder %s5460_s11, 0 }
  0x8f   : > { %5142 = dma.done.wait (%p6480_p4), [#allocation6], 3072   ;;  %p6481_p6 = pmov %p6480_p4 }
  0x90   : > { %p6482_p12 = pmov %p6480_p4 }
  0x91   : > { %5144 = vsyncadd (%p6481_p6), [#allocation6], 4294964224 }
  0x92   : > { %5146 = dma.done.wait (%p6482_p12), [#allocation9], 3072   ;;  %p6483_p0 = pmov %p6480_p4 }
  0x94   : > { %5148 = vsyncadd (%p6483_p0), [#allocation9], 4294964224  ;;  %p6484_p7 = pmov %p6483_p0 }
  0x95   : > { %p6485_p2 = pmov %p6483_p0 }
  0x96   : > { %5150 = dma.done.wait (%p6484_p7), [#allocation12], 2048  }
  0x97   : > { %5152 = vsyncadd (%p6485_p2), [#allocation12], 4294965248  ;;  %s3198_s12 = sshll.u32 %s5629_s13, 6  ;;  %v5650_v0 = vld [vmem:[%s361_s22] sm:$0xff]   ;;  %v428_v1 = vld [vmem:[%s361_s22 + $0x8] sm:$0xff]   ;;  %s5652_s20 = scalar_lea.vmem [#allocation14], %s3190_s2 }
  0x98   : > { %v429_v2 = vld [vmem:[%s361_s22 + $0x10] sm:$0xff]   ;;  %v430_v3 = vld [vmem:[%s361_s22 + $0x18] sm:$0xff]   ;;  %v431_v4 = vld [vmem:[%s361_s22 + $0x20] sm:$0xff]   ;;  %s5654_s23 = scalar_lea.vmem [#allocation15], %s3198_s12  ;;  %v5656_v16 = vmov 0.0   ;;  %v5658_v17 = vmov 0.0  }
  0x99   : > { %v432_v5 = vld [vmem:[%s361_s22 + $0x28] sm:$0xff]   ;;  %v433_v6 = vld [vmem:[%s361_s22 + $0x30] sm:$0xff]   ;;  %v434_v7 = vld [vmem:[%s361_s22 + $0x38] sm:$0xff]   ;;  %v5660_v18 = vmov 0.0   ;;  %v5662_v19 = vmov 0.0   ;;  %v5664_v20 = vmov 0.0  }
  0x9a   : > { %v435_v8 = vld [vmem:[%s361_s22 + $0x40] sm:$0xff]   ;;  %v436_v9 = vld [vmem:[%s361_s22 + $0x48] sm:$0xff]   ;;  %v437_v10 = vld [vmem:[%s361_s22 + $0x50] sm:$0xff]   ;;  %v5666_v21 = vmov 0.0   ;;  %v5668_v22 = vmov 0.0   ;;  %v5670_v23 = vmov 0.0  }
  0x9b   : > { %v438_v11 = vld [vmem:[%s361_s22 + $0x58] sm:$0xff]   ;;  %v439_v12 = vld [vmem:[%s361_s22 + $0x60] sm:$0xff]   ;;  %v440_v13 = vld [vmem:[%s361_s22 + $0x68] sm:$0xff]   ;;  %v5672_v24 = vmov 0.0   ;;  %v5674_v25 = vmov 0.0   ;;  %v5676_v26 = vmov 0.0  }
  0x9c   : > { %v441_v14 = vld [vmem:[%s361_s22 + $0x70] sm:$0xff]   ;;  %v442_v15 = vld [vmem:[%s361_s22 + $0x78] sm:$0xff]   ;;  %v5678_v27 = vmov 0.0   ;;  %v5680_v28 = vmov 0.0   ;;  %v5682_v29 = vmov 0.0   ;;  %v5684_v30 = vmov 0.0  }
  0x9d   : > { %v5686_v31 = vmov 0.0   ;;  %v5688_v32 = vmov 0.0   ;;  %v5690_v33 = vmov 0.0   ;;  %v5692_v34 = vmov 0.0   ;;  %s5753_s15 = smov 0  }
  0x9e   : > { %v5694_v35 = vmov 0.0   ;;  %v5696_v36 = vmov 0.0   ;;  %v5698_v37 = vmov 0.0   ;;  %v5700_v38 = vmov 0.0  }
  0x9f   : > { %v5702_v39 = vmov 0.0   ;;  %v5704_v40 = vmov 0.0   ;;  %v5706_v41 = vmov 0.0   ;;  %v5708_v42 = vmov 0.0  }
  0xa0   : > { %v5710_v43 = vmov 0.0   ;;  %v5712_v44 = vmov 0.0   ;;  %v5714_v45 = vmov 0.0   ;;  %v5716_v46 = vmov 0.0  }
  0xa1   : > { %v5718_v47 = vmov 0.0  }
  0xa2 LB: >> { %v4289_v48 = vld [vmem:[#allocation5 + $0x78] sm:$0xff]   ;;  %v4291_v50 = vld [vmem:[#allocation5 + $0x70] sm:$0xff]   ;;  %v530_v51 = vadd.f32 %v5299_v46, %v5363_v1  ;;  %v532_v52 = vadd.f32 %v5291_v44, %v5355_v3  ;;  %v4293_v54 = vld [vmem:[#allocation5 + $0x68] sm:$0xff]   ;;  %v529_v46 = vadd.f32 %v5303_v47, %v5367_v0  ;;  %s448_s17 = sadd.s32 1, %s5371_s15   ;;  %s5371_s15 = sphi %s5753_s15, %s6596_s15   ;;  %v5367_v0 = vphi %v5650_v0, %v6595_v0   ;;  %v5363_v1 = vphi %v428_v1, %v6594_v1   ;;  %v5359_v2 = vphi %v429_v2, %v6593_v2   ;;  %v5355_v3 = vphi %v430_v3, %v6592_v3   ;;  %v5351_v4 = vphi %v431_v4, %v6591_v4   ;;  %v5347_v5 = vphi %v432_v5, %v6590_v5   ;;  %v5343_v6 = vphi %v433_v6, %v6589_v6   ;;  %v5339_v7 = vphi %v434_v7, %v6588_v7   ;;  %v5335_v8 = vphi %v435_v8, %v6587_v8   ;;  %v5331_v9 = vphi %v436_v9, %v6586_v9   ;;  %v5327_v10 = vphi %v437_v10, %v6585_v10   ;;  %v5323_v11 = vphi %v438_v11, %v6583_v11   ;;  %v5319_v12 = vphi %v439_v12, %v6582_v12   ;;  %v5315_v13 = vphi %v440_v13, %v6580_v13   ;;  %v5311_v14 = vphi %v441_v14, %v6578_v14   ;;  %v5307_v15 = vphi %v442_v15, %v6576_v15   ;;  %v5303_v47 = vphi %v5718_v47, %v6015_v47   ;;  %v5299_v46 = vphi %v5716_v46, %v6017_v46   ;;  %v5295_v45 = vphi %v5714_v45, %v6019_v45   ;;  %v5291_v44 = vphi %v5712_v44, %v6021_v44   ;;  %v5287_v43 = vphi %v5710_v43, %v6023_v43   ;;  %v5283_v42 = vphi %v5708_v42, %v6025_v42   ;;  %v5279_v41 = vphi %v5706_v41, %v6568_v41   ;;  %v5275_v40 = vphi %v5704_v40, %v6567_v40   ;;  %v5271_v39 = vphi %v5702_v39, %v6566_v39   ;;  %v5267_v38 = vphi %v5700_v38, %v6565_v38   ;;  %v5263_v37 = vphi %v5698_v37, %v6564_v37   ;;  %v5259_v36 = vphi %v5696_v36, %v6562_v36   ;;  %v5255_v35 = vphi %v5694_v35, %v6561_v35   ;;  %v5251_v34 = vphi %v5692_v34, %v6559_v34   ;;  %v5247_v33 = vphi %v5690_v33, %v6557_v33   ;;  %v5243_v32 = vphi %v5688_v32, %v6555_v32   ;;  %v5239_v31 = vphi %v5686_v31, %v6553_v31   ;;  %v5235_v30 = vphi %v5684_v30, %v6552_v30   ;;  %v5231_v29 = vphi %v5682_v29, %v6551_v29   ;;  %v5227_v28 = vphi %v5680_v28, %v6550_v28   ;;  %v5223_v27 = vphi %v5678_v27, %v6549_v27   ;;  %v5219_v26 = vphi %v5676_v26, %v6548_v26   ;;  %v5215_v25 = vphi %v5674_v25, %v6008_v25   ;;  %v5211_v24 = vphi %v5672_v24, %v6006_v24   ;;  %v5207_v23 = vphi %v5670_v23, %v6547_v23   ;;  %v5203_v22 = vphi %v5668_v22, %v6546_v22   ;;  %v5199_v21 = vphi %v5666_v21, %v6545_v21   ;;  %v5195_v20 = vphi %v5664_v20, %v6544_v20   ;;  %v5191_v19 = vphi %v5662_v19, %v6543_v19   ;;  %v5187_v18 = vphi %v5660_v18, %v6542_v18   ;;  %v5183_v17 = vphi %v5658_v17, %v6541_v17   ;;  %v5179_v16 = vphi %v5656_v16, %v6540_v16  }
  0xa3   : >> { %v4290_v49 = vld [vmem:[#allocation5 + $0x38] sm:$0xff]   ;;  %3405 = vmatprep.subr.bf16.mxu0 %v4289_v48  ;;  %v4292_v53 = vld [vmem:[#allocation5 + $0x30] sm:$0xff]   ;;  %v4294_v56 = vld [vmem:[#allocation5 + $0x28] sm:$0xff]   ;;  %v531_v48 = vadd.f32 %v5295_v45, %v5359_v2  ;;  %v537_v2 = vadd.f32 %v5271_v39, %v5335_v8  ;;  %p6050_p9 = scmp.ge.s32.totalorder %s448_s17, 2   ;;  %s6596_s15 = smov %s448_s17 }
  0xa4   : >> { %3406 = vmatpush3.bf16.msra.mxu0 %v4290_v49  ;;  %v546_v55 = vpack.c.bf16 %v532_v52, %v530_v51  ;;  %v4295_v57 = vld [vmem:[#allocation5 + $0x60] sm:$0xff]   ;;  %v4297_v59 = vld [vmem:[#allocation5 + $0x58] sm:$0xff]   ;;  %v4299_v61 = vld [vmem:[#allocation5 + $0x50] sm:$0xff]   ;;  %v534_v49 = vadd.f32 %v5283_v42, %v5347_v5  ;;  %v539_v5 = vadd.f32 %v5263_v37, %v5327_v10  ;;  %s3404_s26 = sshll.u32 (%p6050_p9), %s5460_s11, 10  ;;  %s2865_s21 = sshll.u32 (%p6050_p9), %s5654_s23, 4  ;;  %s6335_s21 = int_to_ptr.vmem [resolvable:$true] %s2865_s21 }
  0xa5   : >> { %3407 = vmatprep.subr.bf16.mxu0 %v4291_v50  ;;  %v4296_v58 = vld [vmem:[#allocation5 + $0x20] sm:$0xff]   ;;  %v4298_v60 = vld [vmem:[#allocation5 + $0x18] sm:$0xff]   ;;  %v4300_v62 = vld [vmem:[#allocation5 + $0x10] sm:$0xff]   ;;  %v536_v50 = vadd.f32 %v5275_v40, %v5339_v7  ;;  %v545_v51 = vpack.c.bf16 %v531_v48, %v529_v46  ;;  %v542_v7 = vadd.f32 %v5251_v34, %v5315_v13  ;;  %s6333_s16 = scalar_lea.hbm (%p6050_p9), %s6434_s8, %s3404_s26  ;;  %s2835_s2 = scalar_lea.sflag (%p6050_p9), [#allocation16], %s5629_s13 }
  0xa6   : >> { %681 = vmatprep.mubr.bf16.mxu0 %v546_v55  ;;  %v4301_v63 = vld [vmem:[#allocation5 + $0x48] sm:$0xff]   ;;  %v4303_v3 = vld [vmem:[#allocation5 + $0x40] sm:$0xff]   ;;  %v538_v55 = vadd.f32 %v5267_v38, %v5331_v9  ;;  %v541_v9 = vadd.f32 %v5255_v35, %v5319_v12  ;;  %v4305_v10 = vld [vmem:[#allocation7 + $0x38] sm:$0xff]   ;;  %s4873_s19 = scalar_lea.vmem (%p6050_p9), %s6335_s21, 1024  ;;  %p6624_p10 = scmp.ne.s32.totalorder (%p6050_p9), %s6475_s9, 0 }
  0xa7   : >> { %v4302_v1 = vld [vmem:[#allocation5 + $0x8] sm:$0xff]   ;;  %v4304_v44 = vld [vmem:[#allocation5] sm:$0xff]   ;;  %v548_v52 = vpack.c.bf16 %v536_v50, %v534_v49  ;;  %3581 = vmatprep.subr.bf16.mxu1 %v4305_v10  ;;  %v4310_v12 = vld [vmem:[#allocation7 + $0x10] sm:$0xff]   ;;  %p4874_p8 = scmp.ne.s32.totalorder (%p6050_p9), %s6335_s21, %s4873_s19  ;;  %s5388_s22 = smov (%p6050_p9), [#allocation15]  }
  0xa8   : >> { %3408 = vmatpush3.bf16.msra.mxu0 %v4292_v53  ;;  %v533_v53 = vadd.f32 %v5287_v43, %v5351_v4  ;;  %v544_v4 = vadd.f32 %v5243_v32, %v5307_v15  ;;  %3582 = vmatpush3.bf16.msra.mxu1 %v4305_v10  ;;  %v4307_v13 = vld [vmem:[#allocation7 + $0x28] sm:$0xff]   ;;  %v4308_v15 = vld [vmem:[#allocation7 + $0x20] sm:$0xff]   ;;  %v4309_v32 = vld [vmem:[#allocation7 + $0x18] sm:$0xff]   ;;  %s4877_s12 = sshll.u32 (%p6050_p9), %s5388_s22, 4  ;;  %s4878_s12 = int_to_ptr.vmem [resolvable:$false] %s4877_s12 }
  0xa9   : >> { %3409 = vmatprep.subr.bf16.mxu0 %v4293_v54  ;;  %v535_v54 = vadd.f32 %v5279_v41, %v5343_v6  ;;  %v549_v6 = vpack.c.bf16 %v539_v5, %v537_v2  ;;  %p4875_p11 = pnand (%p6050_p9), %p4874_p8, %p6624_p10  ;;  %p4880_p5 = scmp.lt.s32.totalorder (%p6050_p9), %s6335_s21, %s4878_s12 }
  0xaa   : >> { %v552_v40 = vpack.c.bf16 %v544_v4, %v542_v7 }
  0xab   : > { %p4876_p13 = pneg (%p6050_p9), %p4875_p11 }
  0xac   : >> { %3410 = vmatpush3.bf16.msra.mxu0 %v4294_v56  ;;  %v540_v56 = vadd.f32 %v5259_v36, %v5323_v11  ;;  %v543_v11 = vadd.f32 %v5247_v33, %v5311_v14  ;;  %v4306_v36 = vld [vmem:[#allocation7 + $0x30] sm:$0xff]   ;;  %v4311_v14 = vld [vmem:[#allocation7 + $0x8] sm:$0xff]   ;;  %v4312_v33 = vld [vmem:[#allocation7] sm:$0xff]  }
  0xad   : >> { %3411 = vmatprep.subr.bf16.mxu0 %v4295_v57  ;;  %v547_v57 = vpack.c.bf16 %v535_v54, %v533_v53  ;;  %3583 = vmatprep.subr.bf16.mxu1 %v4306_v36 }
  0xae   : >> { %v550_v0 = vpack.c.bf16 %v540_v56, %v538_v55  ;;  %v551_v8 = vpack.c.bf16 %v543_v11, %v541_v9  ;;  %3584 = vmatpush3.bf16.msra.mxu1 %v4306_v36 }
  0xaf   : >> { %3585 = vmatprep.subr.bf16.mxu1 %v4307_v13 }
  0xb0   : >> { %3412 = vmatpush3.bf16.msra.mxu0 %v4296_v58 }
  0xb1   : >> { %3413 = vmatprep.subr.bf16.mxu0 %v4297_v59 }
  0xb2   : >> { %3586 = vmatpush3.bf16.msra.mxu1 %v4307_v13 }
  0xb3   : >> { %3587 = vmatprep.subr.bf16.mxu1 %v4308_v15 }
  0xb4   : >> { %3414 = vmatpush3.bf16.msra.mxu0 %v4298_v60 }
  0xb5   : >> { %3415 = vmatprep.subr.bf16.mxu0 %v4299_v61 }
  0xb6   : >> { %3588 = vmatpush3.bf16.msra.mxu1 %v4308_v15 }
  0xb7   : >> { %3589 = vmatprep.subr.bf16.mxu1 %v4309_v32 }
  0xb8   : >> { %3416 = vmatpush3.bf16.msra.mxu0 %v4300_v62 }
  0xb9   : >> { %3417 = vmatprep.subr.bf16.mxu0 %v4301_v63 }
  0xba   : >> { %3590 = vmatpush3.bf16.msra.mxu1 %v4309_v32 }
  0xbb   : >> { %3591 = vmatprep.subr.bf16.mxu1 %v4310_v12 }
  0xbc   : >> { %3418 = vmatpush3.bf16.msra.mxu0 %v4302_v1 }
  0xbd   : >> { %3419 = vmatprep.subr.bf16.mxu0 %v4303_v3 }
  0xbe   : >> { %3592 = vmatpush3.bf16.msra.mxu1 %v4310_v12 }
  0xbf   : >> { %3593 = vmatprep.subr.bf16.mxu1 %v4311_v14 }
  0xc0   : >> { %3420 = vmatpush3.bf16.msra.mxu0 %v4304_v44 }
  0xc2   : >> { %3594 = vmatpush3.bf16.msra.mxu1 %v4311_v14 }
  0xc3   : >> { %682 = vmatmul.mubr.bf16.vlgmr.msra.gmra.mxu0 %v545_v51  ;;  %3595 = vmatprep.subr.bf16.mxu1 %v4312_v33 }
  0xc4   : >> { %689 = vmatprep.mubr.bf16.mxu0 %v548_v52 }
  0xc6   : >> { %3596 = vmatpush3.bf16.msra.mxu1 %v4312_v33 }
  0xcb   : >> { %690 = vmatmul.mubr.bf16.gmra.mxu0 %v547_v57 }
  0xcc   : >> { %697 = vmatprep.mubr.bf16.mxu0 %v550_v0 }
  0xd3   : >> { %698 = vmatmul.mubr.bf16.gmra.mxu0 %v549_v6 }
  0xd4   : >> { %705 = vmatprep.mubr.bf16.mxu0 %v552_v40 }
  0xdb   : >> { %706 = vmatmul.mubr.bf16.gmra.mxu0 %v551_v8 }
 0x183   : >> { %v3421_v34 = vpop.f32.mrf.mxu0 }
 0x185   : >> { %v3422_v35 = vpop.f32.mrf.mxu0 }
 0x186   : >> { %v3423_v37 = vadd.f32 %v3422_v35, %v3421_v34 }
 0x187   : >> { %v3424_v38 = vpop.f32.mrf.mxu0 }
 0x188   : >> { %v3215_v39 = vmul.f32 -1.442695, %v3423_v37 }
 0x189   : >> { %v3425_v41 = vpop.f32.mrf.mxu0 }
 0x18a   : >> { %4361 = vpow2.f32 %v3215_v39  ;;  %v3426_v42 = vadd.f32 %v3425_v41, %v3424_v38 }
 0x18b   : >> { %v3427_v43 = vpop.f32.mrf.mxu0 }
 0x18c   : >> { %v3216_v45 = vmul.f32 -1.442695, %v3426_v42 }
 0x18d   : >> { %v3428_v47 = vpop.f32.mrf.mxu0 }
 0x18e   : >> { %4363 = vpow2.f32 %v3216_v45  ;;  %v3429_v58 = vadd.f32 %v3428_v47, %v3427_v43 }
 0x18f   : >> { %v3430_v59 = vpop.f32.mrf.mxu0 }
 0x190   : >> { %v3217_v60 = vmul.f32 -1.442695, %v3429_v58 }
 0x191   : >> { %v3431_v61 = vpop.f32.mrf.mxu0 }
 0x192   : >> { %4365 = vpow2.f32 %v3217_v60  ;;  %v3432_v62 = vadd.f32 %v3431_v61, %v3430_v59 }
 0x193   : >> { %v3433_v63 = vpop.f32.mrf.mxu0 }
 0x194   : >> { %v3218_v1 = vmul.f32 -1.442695, %v3432_v62 }
 0x195   : >> { %v3434_v3 = vpop.f32.mrf.mxu0 }
 0x196   : >> { %4367 = vpow2.f32 %v3218_v1  ;;  %v3435_v44 = vadd.f32 %v3434_v3, %v3433_v63  ;;  %v4313_v1 = vld [vmem:[#allocation8 + $0x38] sm:$0xff]   ;;  %v4316_v3 = vld [vmem:[#allocation8 + $0x20] sm:$0xff]  }
 0x197   : >> { %v4362_v46 = vpop.eup %4361  ;;  %v3436_v48 = vpop.f32.mrf.mxu0  ;;  %3605 = vmatprep.subr.bf16.mxu0 %v4313_v1 }
 0x198   : >> { %v738_v49 = vadd.f32 1.0, %v4362_v46  ;;  %v3219_v50 = vmul.f32 -1.442695, %v3435_v44  ;;  %3606 = vmatpush3.bf16.msra.mxu0 %v4313_v1  ;;  %v4317_v44 = vld [vmem:[#allocation8 + $0x18] sm:$0xff]   ;;  %v4320_v46 = vld [vmem:[#allocation8] sm:$0xff]  }
 0x199   : >> { %v3437_v51 = vpop.f32.mrf.mxu0 }
 0x19a   : >> { %v3438_v52 = vadd.f32 %v3437_v51, %v3436_v48  ;;  %4369 = vpow2.f32 %v3219_v50  ;;  %v4321_v48 = vld [vmem:[#allocation13 + $0x38] sm:$0xff]   ;;  %v4323_v50 = vld [vmem:[#allocation13 + $0x28] sm:$0xff]   ;;  %v4324_v51 = vld [vmem:[#allocation13 + $0x20] sm:$0xff]  }
 0x19b   : >> { %v4364_v53 = vpop.eup %4363  ;;  %v3439_v54 = vpop.f32.mrf.mxu0  ;;  %4371 = vrcp.f32 %v738_v49  ;;  %v4322_v49 = vld [vmem:[#allocation13 + $0x30] sm:$0xff]   ;;  %3629 = vmatprep.subr.bf16.mxu1 %v4321_v48 }
 0x19c   : >> { %v739_v55 = vadd.f32 1.0, %v4364_v53  ;;  %v3220_v56 = vmul.f32 -1.442695, %v3438_v52  ;;  %v4325_v52 = vld [vmem:[#allocation13 + $0x18] sm:$0xff]  }
 0x19d   : >> { %v3440_v57 = vpop.f32.mrf.mxu0 }
 0x19e   : >> { %4373 = vrcp.f32 %v739_v55  ;;  %v3441_v0 = vadd.f32 %v3440_v57, %v3439_v54 }
 0x19f   : >> { %v4366_v2 = vpop.eup %4365  ;;  %4375 = vpow2.f32 %v3220_v56  ;;  %v3442_v5 = vpop.f32.mrf.mxu0 }
 0x1a0   : >> { %v740_v7 = vadd.f32 1.0, %v4366_v2  ;;  %v3221_v4 = vmul.f32 -1.442695, %v3441_v0 }
 0x1a1   : >> { %v3443_v6 = vpop.f32.mrf.mxu0 }
 0x1a2   : >> { %v3444_v40 = vadd.f32 %v3443_v6, %v3442_v5  ;;  %4377 = vpow2.f32 %v3221_v4 }
 0x1a3   : >> { %v4368_v9 = vpop.eup %4367  ;;  %4379 = vrcp.f32 %v740_v7 }
 0x1a4   : >> { %v741_v11 = vadd.f32 1.0, %v4368_v9  ;;  %v3222_v8 = vmul.f32 -1.442695, %v3444_v40 }
 0x1a6   : >> { %4381 = vrcp.f32 %v741_v11 }
 0x1a7   : >> { %4383 = vpow2.f32 %v3222_v8  ;;  %v4370_v10 = vpop.eup %4369 }
 0x1a8   : >> { %v5883_v36 = vpop.eup %4371  ;;  %v742_v13 = vadd.f32 1.0, %v4370_v10 }
 0x1a9   : >> { %v778_v12 = vadd.f32 %v5239_v31, %v5883_v36 }
 0x1aa   : >> { %4385 = vrcp.f32 %v742_v13 }
 0x1ab   : >> { %v5885_v15 = vpop.eup %4373 }
 0x1ac   : >> { %v4376_v32 = vpop.eup %4375  ;;  %v779_v14 = vadd.f32 %v5235_v30, %v5885_v15 }
 0x1ad   : >> { %v743_v33 = vadd.f32 1.0, %v4376_v32 }
 0x1ae   : >> { %v786_v34 = vpack.c.bf16 %v779_v14, %v778_v12 }
 0x1af   : >> { %4387 = vrcp.f32 %v743_v33  ;;  %v4378_v35 = vpop.eup %4377 }
 0x1b0   : >> { %3597 = vmatprep.mubr.bf16.mxu1 %v786_v34  ;;  %v5891_v37 = vpop.eup %4379  ;;  %v744_v38 = vadd.f32 1.0, %v4378_v35 }
 0x1b1   : >> { %v780_v42 = vadd.f32 %v5231_v29, %v5891_v37 }
 0x1b2   : >> { %4389 = vrcp.f32 %v744_v38 }
 0x1b3   : >> { %v5893_v39 = vpop.eup %4381 }
 0x1b4   : >> { %v4384_v41 = vpop.eup %4383  ;;  %v781_v31 = vadd.f32 %v5227_v28, %v5893_v39 }
 0x1b5   : >> { %v745_v30 = vadd.f32 1.0, %v4384_v41 }
 0x1b6   : >> { %v787_v43 = vpack.c.bf16 %v781_v31, %v780_v42 }
 0x1b7   : >> { %4391 = vrcp.f32 %v745_v30  ;;  %v5899_v45 = vpop.eup %4385 }
 0x1b8   : >> { %3598 = vmatmul.mubr.bf16.vlgmr.msra.gmra.mxu1 %v787_v43  ;;  %v782_v58 = vadd.f32 %v5223_v27, %v5899_v45  ;;  %v4314_v27 = vld [vmem:[#allocation8 + $0x30] sm:$0xff]  }
 0x1b9   : >> { %3607 = vmatprep.subr.bf16.mxu0 %v4314_v27  ;;  %3630 = vmatpush3.bf16.msra.mxu1 %v4321_v48 }
 0x1ba   : >> { %3608 = vmatpush3.bf16.msra.mxu0 %v4314_v27  ;;  %3631 = vmatprep.subr.bf16.mxu1 %v4322_v49 }
 0x1bc   : >> { %v5901_v47 = vpop.eup %4387 }
 0x1bd   : >> { %v783_v59 = vadd.f32 %v5219_v26, %v5901_v47  ;;  %v4315_v26 = vld [vmem:[#allocation8 + $0x28] sm:$0xff]   ;;  %3632 = vmatpush3.bf16.msra.mxu1 %v4322_v49 }
 0x1be   : >> { %3609 = vmatprep.subr.bf16.mxu0 %v4315_v26  ;;  %3633 = vmatprep.subr.bf16.mxu1 %v4323_v50 }
 0x1bf   : >> { %v788_v60 = vpack.c.bf16 %v783_v59, %v782_v58  ;;  %v5907_v29 = vpop.eup %4389  ;;  %3610 = vmatpush3.bf16.msra.mxu0 %v4315_v26 }
 0x1c0   : >> { %v784_v61 = vadd.f32 %v5215_v25, %v5907_v29  ;;  %3611 = vmatprep.subr.bf16.mxu0 %v4316_v3  ;;  %v4318_v25 = vld [vmem:[#allocation8 + $0x10] sm:$0xff]  }
 0x1c1   : >> { %3601 = vmatprep.mubr.bf16.mxu1 %v788_v60  ;;  %3634 = vmatpush3.bf16.msra.mxu1 %v4323_v50 }
 0x1c2   : >> { %3635 = vmatprep.subr.bf16.mxu1 %v4324_v51 }
 0x1c3   : >> { %3612 = vmatpush3.bf16.msra.mxu0 %v4316_v3 }
 0x1c4   : >> { %v5909_v28 = vpop.eup %4391  ;;  %3613 = vmatprep.subr.bf16.mxu0 %v4317_v44 }
 0x1c5   : >> { %v785_v62 = vadd.f32 %v5211_v24, %v5909_v28  ;;  %v4319_v24 = vld [vmem:[#allocation8 + $0x8] sm:$0xff]   ;;  %3636 = vmatpush3.bf16.msra.mxu1 %v4324_v51 }
 0x1c6   : >> { %3637 = vmatprep.subr.bf16.mxu1 %v4325_v52 }
 0x1c7   : >> { %v789_v63 = vpack.c.bf16 %v785_v62, %v784_v61  ;;  %3614 = vmatpush3.bf16.msra.mxu0 %v4317_v44 }
 0x1c8   : >> { %3615 = vmatprep.subr.bf16.mxu0 %v4318_v25 }
 0x1c9   : >> { %3602 = vmatmul.mubr.bf16.gmra.mxu1 %v789_v63 }
 0x1ca   : >> { %3638 = vmatpush3.bf16.msra.mxu1 %v4325_v52 }
 0x1cb   : >> { %3616 = vmatpush3.bf16.msra.mxu0 %v4318_v25 }
 0x1cc   : >> { %3617 = vmatprep.subr.bf16.mxu0 %v4319_v24 }
 0x1cf   : >> { %3618 = vmatpush3.bf16.msra.mxu0 %v4319_v24 }
 0x1d0   : >> { %3619 = vmatprep.subr.bf16.mxu0 %v4320_v46 }
 0x1d3   : >> { %3620 = vmatpush3.bf16.msra.mxu0 %v4320_v46 }
 0x278   : >> { %v3599_v53 = vpop.f32.mrf.mxu1 }
 0x279   : >> { %v3233_v54 = vmul.f32 -1.442695, %v3599_v53  ;;  %v4326_v53 = vld [vmem:[#allocation13 + $0x10] sm:$0xff]  }
 0x27a   : >> { %v872_v55 = vpop.f32.mrf.mxu1  ;;  %3639 = vmatprep.subr.bf16.mxu1 %v4326_v53 }
 0x27b   : >> { %4393 = vpow2.f32 %v3233_v54  ;;  %v3231_v56 = vmul.f32 -1.442695, %v872_v55  ;;  %3640 = vmatpush3.bf16.msra.mxu1 %v4326_v53  ;;  %v4327_v54 = vld [vmem:[#allocation13 + $0x8] sm:$0xff]  }
 0x27c   : >> { %v3600_v57 = vpop.f32.mrf.mxu1  ;;  %3641 = vmatprep.subr.bf16.mxu1 %v4327_v54 }
 0x27d   : >> { %4395 = vpow2.f32 %v3231_v56  ;;  %v3234_v0 = vmul.f32 -1.442695, %v3600_v57 }
 0x27e   : >> { %v875_v2 = vpop.f32.mrf.mxu1 }
 0x27f   : >> { %4397 = vpow2.f32 %v3234_v0  ;;  %v3232_v5 = vmul.f32 -1.442695, %v875_v2  ;;  %3642 = vmatpush3.bf16.msra.mxu1 %v4327_v54 }
 0x281   : >> { %4399 = vpow2.f32 %v3232_v5 }
 0x288   : >> { %v4394_v7 = vpop.eup %4393 }
 0x289   : >> { %v929_v4 = vadd.f32 1.0, %v4394_v7  ;;  %v3603_v6 = vpop.f32.mrf.mxu1 }
 0x28a   : >> { %v4396_v40 = vpop.eup %4395  ;;  %v3237_v9 = vmul.f32 -1.442695, %v3603_v6 }
 0x28b   : >> { %4401 = vrcp.f32 %v929_v4  ;;  %v927_v11 = vadd.f32 1.0, %v4396_v40  ;;  %v888_v8 = vpop.f32.mrf.mxu1 }
 0x28c   : >> { %v4398_v10 = vpop.eup %4397  ;;  %4403 = vpow2.f32 %v3237_v9  ;;  %v3235_v13 = vmul.f32 -1.442695, %v888_v8 }
 0x28d   : >> { %4405 = vrcp.f32 %v927_v11  ;;  %v930_v32 = vadd.f32 1.0, %v4398_v10  ;;  %v3604_v12 = vpop.f32.mrf.mxu1 }
 0x28e   : >> { %v4400_v14 = vpop.eup %4399  ;;  %4407 = vpow2.f32 %v3235_v13  ;;  %v3238_v33 = vmul.f32 -1.442695, %v3604_v12 }
 0x28f   : >> { %4409 = vrcp.f32 %v930_v32  ;;  %v928_v34 = vadd.f32 1.0, %v4400_v14  ;;  %v891_v35 = vpop.f32.mrf.mxu1  ;;  %v4329_v14 = vld [vmem:[#allocation11 + $0x38] sm:$0xff]  }
 0x290   : >> { %4411 = vpow2.f32 %v3238_v33  ;;  %v3236_v38 = vmul.f32 -1.442695, %v891_v35  ;;  %3653 = vmatprep.subr.bf16.mxu0 %v4329_v14  ;;  %v4330_v33 = vld [vmem:[#allocation11 + $0x30] sm:$0xff]   ;;  %v4332_v35 = vld [vmem:[#allocation11 + $0x20] sm:$0xff]  }
 0x291   : >> { %4413 = vrcp.f32 %v928_v34  ;;  %v4331_v34 = vld [vmem:[#allocation11 + $0x28] sm:$0xff]  }
 0x292   : >> { %4415 = vpow2.f32 %v3236_v38  ;;  %v4333_v38 = vld [vmem:[#allocation11 + $0x18] sm:$0xff]  }
 0x298   : >> { %v5915_v41 = vpop.eup %4401 }
 0x299   : >> { %v4404_v42 = vpop.eup %4403  ;;  %v969_v44 = vadd.f32 %v5199_v21, %v5915_v41 }
 0x29a   : >> { %v5917_v31 = vpop.eup %4405  ;;  %v933_v60 = vadd.f32 1.0, %v4404_v42  ;;  %v4334_v42 = vld [vmem:[#allocation11 + $0x10] sm:$0xff]  }
 0x29b   : >> { %v4408_v30 = vpop.eup %4407  ;;  %v967_v27 = vadd.f32 %v5207_v23, %v5917_v31 }
 0x29c   : >> { %v5919_v43 = vpop.eup %4409  ;;  %v931_v58 = vadd.f32 1.0, %v4408_v30  ;;  %v4335_v30 = vld [vmem:[#allocation11 + $0x8] sm:$0xff]  }
 0x29d   : >> { %v4412_v59 = vpop.eup %4411  ;;  %v970_v63 = vadd.f32 %v5195_v20, %v5919_v43 }
 0x29e   : >> { %v5921_v61 = vpop.eup %4413  ;;  %v934_v62 = vadd.f32 1.0, %v4412_v59  ;;  %4417 = vrcp.f32 %v931_v58  ;;  %v4336_v58 = vld [vmem:[#allocation11] sm:$0xff]  }
 0x29f   : >> { %v4416_v1 = vpop.eup %4415  ;;  %v968_v26 = vadd.f32 %v5203_v22, %v5921_v61  ;;  %v976_v24 = vpack.c.bf16 %v970_v63, %v969_v44 }
 0x2a0   : >> { %4419 = vrcp.f32 %v934_v62  ;;  %v932_v3 = vadd.f32 1.0, %v4416_v1 }
 0x2a1   : >> { %4421 = vrcp.f32 %v933_v60  ;;  %v975_v25 = vpack.c.bf16 %v968_v26, %v967_v27 }
 0x2a2   : >> { %4423 = vrcp.f32 %v932_v3 }
 0x2a3   : >> { %3621 = vmatprep.mubr.bf16.mxu0 %v975_v25 }
 0x2a4   : >> { %3622 = vmatmul.mubr.bf16.vlgmr.msra.gmra.mxu0 %v976_v24 }
 0x2a5   : >> { %3654 = vmatpush3.bf16.msra.mxu0 %v4329_v14 }
 0x2a6   : >> { %3655 = vmatprep.subr.bf16.mxu0 %v4330_v33 }
 0x2a9   : >> { %3656 = vmatpush3.bf16.msra.mxu0 %v4330_v33 }
 0x2aa   : >> { %3657 = vmatprep.subr.bf16.mxu0 %v4331_v34 }
 0x2ab   : >> { %v5931_v20 = vpop.eup %4417 }
 0x2ac   : >> { %v971_v21 = vadd.f32 %v5191_v19, %v5931_v20 }
 0x2ad   : >> { %v5933_v46 = vpop.eup %4419  ;;  %3658 = vmatpush3.bf16.msra.mxu0 %v4331_v34 }
 0x2ae   : >> { %v5935_v48 = vpop.eup %4421  ;;  %v974_v22 = vadd.f32 %v5179_v16, %v5933_v46  ;;  %v4328_v16 = vld [vmem:[#allocation13] sm:$0xff]   ;;  %3659 = vmatprep.subr.bf16.mxu0 %v4332_v35 }
 0x2af   : >> { %v5937_v23 = vpop.eup %4423  ;;  %v973_v50 = vadd.f32 %v5183_v17, %v5935_v48  ;;  %3643 = vmatprep.subr.bf16.mxu1 %v4328_v16 }
 0x2b0   : >> { %v972_v49 = vadd.f32 %v5187_v18, %v5937_v23  ;;  %3644 = vmatpush3.bf16.msra.mxu1 %v4328_v16 }
 0x2b1   : >> { %v978_v52 = vpack.c.bf16 %v974_v22, %v973_v50  ;;  %3660 = vmatpush3.bf16.msra.mxu0 %v4332_v35  ;;  %v4339_v35 = vld [vmem:[#allocation10 + $0x74] ss:$8 sps:$4 sm:$0xff]  }
 0x2b2   : >> { %v977_v51 = vpack.c.bf16 %v972_v49, %v971_v21  ;;  %3661 = vmatprep.subr.bf16.mxu0 %v4333_v38  ;;  %1578 = vmatprep.subr.bf16.mxu1 %v4339_v35 }
 0x2b4   : >> { %3625 = vmatprep.mubr.bf16.mxu0 %v977_v51 }
 0x2b5   : >> { %3626 = vmatmul.mubr.bf16.gmra.mxu0 %v978_v52 }
 0x2b6   : >> { %3662 = vmatpush3.bf16.msra.mxu0 %v4333_v38  ;;  %v4337_v38 = vld [vmem:[#allocation10 + $0x70] ss:$8 sps:$4 sm:$0xff]  }
 0x2b7   : >> { %3663 = vmatprep.subr.bf16.mxu0 %v4334_v42 }
 0x2ba   : >> { %3664 = vmatpush3.bf16.msra.mxu0 %v4334_v42  ;;  %v4342_v42 = vld [vmem:[#allocation10 + $0x64] ss:$8 sps:$4 sm:$0xff]  }
 0x2bb   : >> { %3665 = vmatprep.subr.bf16.mxu0 %v4335_v30 }
 0x2be   : >> { %3666 = vmatpush3.bf16.msra.mxu0 %v4335_v30  ;;  %v4340_v30 = vld [vmem:[#allocation10 + $0x60] ss:$8 sps:$4 sm:$0xff]  }
 0x2bf   : >> { %3667 = vmatprep.subr.bf16.mxu0 %v4336_v58 }
 0x2c2   : >> { %3668 = vmatpush3.bf16.msra.mxu0 %v4336_v58 }
 0x364   : >> { %v3623_v19 = vpop.f32.mrf.mxu0 }
 0x365   : >> { %v1110_v2 = vadd.f32 %v3623_v19, %v3623_v19 }
 0x366   : >> { %v1061_v55 = vpop.f32.mrf.mxu0 }
 0x367   : >> { %v1108_v0 = vadd.f32 %v1061_v55, %v1061_v55 }
 0x368   : >> { %v3624_v56 = vpop.f32.mrf.mxu0 }
 0x369   : >> { %v1111_v18 = vadd.f32 %v3624_v56, %v3624_v56 }
 0x36a   : >> { %v1064_v57 = vpop.f32.mrf.mxu0 }
 0x36b   : >> { %v1109_v17 = vadd.f32 %v1064_v57, %v1064_v57  ;;  %v1117_v7 = vpack.c.bf16 %v1111_v18, %v1110_v2 }
 0x36d   : >> { %v1116_v5 = vpack.c.bf16 %v1109_v17, %v1108_v0 }
 0x36f   : >> { %3645 = vmatprep.mubr.bf16.mxu1 %v1116_v5 }
 0x370   : >> { %3646 = vmatmul.mubr.bf16.vlgmr.msra.gmra.mxu1 %v1117_v7 }
 0x371   : >> { %1579 = vmatpush1.bf16.msra.mxu1 %v4337_v38 }
 0x372   : >> { %1580 = vmatprep.subr.bf16.mxu1 %v4342_v42 }
 0x375   : >> { %v3627_v4 = vpop.f32.mrf.mxu0  ;;  %1581 = vmatpush1.bf16.msra.mxu1 %v4340_v30 }
 0x376   : >> { %v1114_v13 = vadd.f32 %v3627_v4, %v3627_v4 }
 0x377   : >> { %v1077_v6 = vpop.f32.mrf.mxu0 }
 0x378   : >> { %v1112_v8 = vadd.f32 %v1077_v6, %v1077_v6 }
 0x379   : >> { %v3628_v40 = vpop.f32.mrf.mxu0 }
 0x37a   : >> { %v1115_v9 = vadd.f32 %v3628_v40, %v3628_v40 }
 0x37b   : >> { %v1080_v11 = vpop.f32.mrf.mxu0 }
 0x37c   : >> { %v1113_v10 = vadd.f32 %v1080_v11, %v1080_v11  ;;  %v1119_v12 = vpack.c.bf16 %v1115_v9, %v1114_v13 }
 0x37e   : >> { %v1118_v32 = vpack.c.bf16 %v1113_v10, %v1112_v8 }
 0x380   : >> { %3649 = vmatprep.mubr.bf16.mxu1 %v1118_v32 }
 0x381   : >> { %3650 = vmatmul.mubr.bf16.gmra.mxu1 %v1119_v12 }
 0x430   : >> { %v3647_v59 = vpop.f32.mrf.mxu1 }
 0x431   : >> { %v3257_v60 = vmul.f32 -1.442695, %v3647_v59 }
 0x432   : >> { %v1202_v62 = vpop.f32.mrf.mxu1 }
 0x433   : >> { %4425 = vpow2.f32 %v3257_v60  ;;  %v3255_v63 = vmul.f32 -1.442695, %v1202_v62 }
 0x434   : >> { %v3648_v1 = vpop.f32.mrf.mxu1 }
 0x435   : >> { %4427 = vpow2.f32 %v3255_v63  ;;  %v3258_v27 = vmul.f32 -1.442695, %v3648_v1  ;;  %v4346_v1 = vld [vmem:[#allocation10 + $0x40] ss:$8 sps:$4 sm:$0xff]  }
 0x436   : >> { %v1205_v26 = vpop.f32.mrf.mxu1 }
 0x437   : >> { %4429 = vpow2.f32 %v3258_v27  ;;  %v3256_v3 = vmul.f32 -1.442695, %v1205_v26  ;;  %v4349_v27 = vld [vmem:[#allocation10 + $0x30] ss:$8 sps:$4 sm:$0xff]   ;;  %v4354_v26 = vld [vmem:[#allocation10 + $0x24] ss:$8 sps:$4 sm:$0xff]  }
 0x439   : >> { %4431 = vpow2.f32 %v3256_v3  ;;  %v4352_v3 = vld [vmem:[#allocation10 + $0x20] ss:$8 sps:$4 sm:$0xff]  }
 0x440   : >> { %v4426_v44 = vpop.eup %4425 }
 0x441   : >> { %v1259_v25 = vadd.f32 1.0, %v4426_v44  ;;  %v3651_v24 = vpop.f32.mrf.mxu1  ;;  %v4357_v44 = vld [vmem:[#allocation10 + $0x14] ss:$8 sps:$4 sm:$0xff]  }
 0x442   : >> { %v4428_v22 = vpop.eup %4427  ;;  %v3261_v21 = vmul.f32 -1.442695, %v3651_v24  ;;  %v4360_v24 = vld [vmem:[#allocation10 + $0x4] ss:$8 sps:$4 sm:$0xff]  }
 0x443   : >> { %4433 = vrcp.f32 %v1259_v25  ;;  %v1257_v49 = vadd.f32 1.0, %v4428_v22  ;;  %v1218_v50 = vpop.f32.mrf.mxu1  ;;  %v4355_v25 = vld [vmem:[#allocation10 + $0x10] ss:$8 sps:$4 sm:$0xff]  }
 0x444   : >> { %v4430_v51 = vpop.eup %4429  ;;  %4435 = vpow2.f32 %v3261_v21  ;;  %v3259_v52 = vmul.f32 -1.442695, %v1218_v50 }
 0x445   : >> { %4437 = vrcp.f32 %v1257_v49  ;;  %v1260_v53 = vadd.f32 1.0, %v4430_v51  ;;  %v3652_v54 = vpop.f32.mrf.mxu1 }
 0x446   : >> { %v4432_v16 = vpop.eup %4431  ;;  %4439 = vpow2.f32 %v3259_v52  ;;  %v3262_v19 = vmul.f32 -1.442695, %v3652_v54 }
 0x447   : >> { %4441 = vrcp.f32 %v1260_v53  ;;  %v1258_v55 = vadd.f32 1.0, %v4432_v16  ;;  %v1221_v56 = vpop.f32.mrf.mxu1 }
 0x448   : >> { %4443 = vpow2.f32 %v3262_v19  ;;  %v3260_v18 = vmul.f32 -1.442695, %v1221_v56 }
 0x449   : >> { %4445 = vrcp.f32 %v1258_v55 }
 0x44a   : >> { %4447 = vpow2.f32 %v3260_v18 }
 0x450   : >> { %v5947_v21 = vpop.eup %4433  }
 0x451   : >> { %6486 = vst [vmem:[#allocation23_spill] sm:$0xff] %v5947_v21  ;;  %v6487_v57 = vmov %v5947_v21  ;;  %v4436_v0 = vpop.eup %4435  ;;  %v5386_v21 = vmov 0  }
 0x452   : >> { %v5949_v17 = vpop.eup %4437   ;;  %v1263_v6 = vadd.f32 1.0, %v4436_v0  ;;  %v1299_v32 = vadd.f32 %v6487_v57, %v5915_v41  ;;  %1610 = vmatprep.mubr.bf16.mxu1 %v5386_v21 }
 0x453   : >> { %6488 = vst [vmem:[#allocation24_spill] sm:$0xff] %v5949_v17  ;;  %v6489_v58 = vmov %v5949_v17  ;;  %v4440_v2 = vpop.eup %4439 }
 0x454   : >> { %v5951_v5 = vpop.eup %4441   ;;  %v1261_v7 = vadd.f32 1.0, %v4440_v2  ;;  %v1297_v8 = vadd.f32 %v6489_v58, %v5917_v31 }
 0x455   : >> { %6490 = vst [vmem:[#allocation25_spill] sm:$0xff] %v5951_v5  ;;  %v6491_v59 = vmov %v5951_v5  ;;  %v4444_v4 = vpop.eup %4443 }
 0x456   : >> { %v5953_v22 = vpop.eup %4445   ;;  %v1264_v40 = vadd.f32 1.0, %v4444_v4  ;;  %v1300_v9 = vadd.f32 %v6491_v59, %v5919_v43  ;;  %4449 = vrcp.f32 %v1261_v7 }
 0x457   : >> { %6492 = vst [vmem:[#allocation26_spill] sm:$0xff] %v5953_v22  ;;  %v6493_v60 = vmov %v5953_v22  ;;  %v4448_v11 = vpop.eup %4447  ;;  %v4358_v22 = vld [vmem:[#allocation10] ss:$8 sps:$4 sm:$0xff]  }
 0x458   : >> { %v1298_v10 = vadd.f32 %v6493_v60, %v5921_v61  ;;  %4451 = vrcp.f32 %v1264_v40  ;;  %v1262_v13 = vadd.f32 1.0, %v4448_v11  ;;  %v1306_v14 = vpack.c.bf16 %v1300_v9, %v1299_v32 }
 0x459   : >> { %4453 = vrcp.f32 %v1263_v6 }
 0x45a   : >> { %v1305_v12 = vpack.c.bf16 %v1298_v10, %v1297_v8  ;;  %4455 = vrcp.f32 %v1262_v13 }
 0x45c   : >> { %3669 = vmatprep.mubr.bf16.mxu0 %v1305_v12 }
 0x45d   : >> { %3670 = vmatmul.mubr.bf16.vlgmr.msra.gmra.mxu0 %v1306_v14 }
 0x463   : >> { %v5963_v19 = vpop.eup %4449  }
 0x464   : >> { %6494 = vst [vmem:[#allocation27_spill] sm:$0xff] %v5963_v19  ;;  %v6495_v62 = vmov %v5963_v19 }
 0x465   : >> { %v5965_v16 = vpop.eup %4451   ;;  %v1301_v41 = vadd.f32 %v6495_v62, %v5931_v20  ;;  %v4343_v20 = vld [vmem:[#allocation10 + $0x50] ss:$8 sps:$4 sm:$0xff]  }
 0x466   : >> { %6496 = vst [vmem:[#allocation28_spill] sm:$0xff] %v5965_v16  ;;  %v6497_v63 = vmov %v5965_v16  ;;  %v5967_v17 = vpop.eup %4453  }
 0x467   : >> { %6498 = vst [vmem:[#allocation29_spill] sm:$0xff] %v5967_v17  ;;  %v6499_v49 = vmov %v5967_v17  ;;  %v5969_v18 = vpop.eup %4455   ;;  %v1304_v31 = vadd.f32 %v6497_v63, %v5933_v46  ;;  %v4345_v46 = vld [vmem:[#allocation10 + $0x54] ss:$8 sps:$4 sm:$0xff]  }
 0x468   : >> { %6500 = vst [vmem:[#allocation30_spill] sm:$0xff] %v5969_v18  ;;  %v6501_v50 = vmov %v5969_v18  ;;  %v1303_v61 = vadd.f32 %v6499_v49, %v5935_v48  ;;  %1582 = vmatprep.subr.bf16.mxu1 %v4345_v46  ;;  %v4351_v48 = vld [vmem:[#allocation10 + $0x34] ss:$8 sps:$4 sm:$0xff]  }
 0x469   : >> { %v1302_v43 = vadd.f32 %v6501_v50, %v5937_v23  ;;  %1583 = vmatpush1.bf16.msra.mxu1 %v4343_v20  ;;  %v4348_v23 = vld [vmem:[#allocation10 + $0x44] ss:$8 sps:$4 sm:$0xff]  }
 0x46a   : >> { %v1308_v34 = vpack.c.bf16 %v1304_v31, %v1303_v61  ;;  %1584 = vmatprep.subr.bf16.mxu1 %v4348_v23 }
 0x46b   : >> { %v1307_v33 = vpack.c.bf16 %v1302_v43, %v1301_v41 }
 0x46d   : >> { %3673 = vmatprep.mubr.bf16.mxu0 %v1307_v33  ;;  %1585 = vmatpush1.bf16.msra.mxu1 %v4346_v1 }
 0x46e   : >> { %3674 = vmatmul.mubr.bf16.gmra.mxu0 %v1308_v34  ;;  %1586 = vmatprep.subr.bf16.mxu1 %v4351_v48 }
 0x471   : >> { %1587 = vmatpush1.bf16.msra.mxu1 %v4349_v27 }
 0x472   : >> { %1588 = vmatprep.subr.bf16.mxu1 %v4354_v26 }
 0x475   : >> { %1589 = vmatpush1.bf16.msra.mxu1 %v4352_v3 }
 0x476   : >> { %1590 = vmatprep.subr.bf16.mxu1 %v4357_v44 }
 0x479   : >> { %1591 = vmatpush1.bf16.msra.mxu1 %v4355_v25 }
 0x47a   : >> { %1592 = vmatprep.subr.bf16.mxu1 %v4360_v24 }
 0x47d   : >> { %1593 = vmatpush1.bf16.msra.mxu1 %v4358_v22  ;;  %v6546_v22 = vld [vmem:[#allocation26_spill] sm:$0xff] }
 0x51d   : >> { %v3671_v51 = vpop.f32.mrf.mxu0 }
 0x51e   : >> { %v3273_v55 = vmul.f32 -1.442695, %v3671_v51 }
 0x51f   : >> { %v1391_v52 = vpop.f32.mrf.mxu0 }
 0x520   : >> { %v3271_v53 = vmul.f32 -1.442695, %v1391_v52 }
 0x521   : >> { %v3672_v54 = vpop.f32.mrf.mxu0 }
 0x522   : >> { %4457 = vpow2.f32 %v3271_v53  ;;  %v3274_v16 = vmul.f32 -1.442695, %v3672_v54 }
 0x523   : >> { %v1394_v19 = vpop.f32.mrf.mxu0 }
 0x524   : >> { %v3272_v56 = vmul.f32 -1.442695, %v1394_v19  ;;  %4459 = vpow2.f32 %v3274_v16  ;;  %v6540_v16 = vmov %v6497_v63  ;;  %v6543_v19 = vmov %v6495_v62 }
 0x526   : >> { %4461 = vpow2.f32 %v3272_v56 }
 0x527   : >> { %4463 = vpow2.f32 %v3273_v55 }
 0x52e   : >> { %v3675_v18 = vpop.f32.mrf.mxu0 }
 0x52f   : >> { %v4458_v0 = vpop.eup %4457  ;;  %v3277_v10 = vmul.f32 -1.442695, %v3675_v18  ;;  %v6542_v18 = vmov %v6501_v50 }
 0x530   : >> { %v1446_v17 = vadd.f32 1.0, %v4458_v0  ;;  %v1407_v2 = vpop.f32.mrf.mxu0 }
 0x531   : >> { %v3275_v5 = vmul.f32 -1.442695, %v1407_v2  ;;  %v4460_v7 = vpop.eup %4459 }
 0x532   : >> { %v3676_v4 = vpop.f32.mrf.mxu0  ;;  %v1449_v32 = vadd.f32 1.0, %v4460_v7 }
 0x533   : >> { %v4462_v6 = vpop.eup %4461  ;;  %4465 = vpow2.f32 %v3275_v5  ;;  %v3278_v40 = vmul.f32 -1.442695, %v3676_v4 }
 0x534   : >> { %4467 = vrcp.f32 %v1446_v17  ;;  %v1447_v9 = vadd.f32 1.0, %v4462_v6  ;;  %v1410_v11 = vpop.f32.mrf.mxu0  ;;  %v4464_v8 = vpop.eup %4463  ;;  %v6541_v17 = vmov %v6499_v49 }
 0x535   : >> { %4469 = vpow2.f32 %v3278_v40  ;;  %v3276_v13 = vmul.f32 -1.442695, %v1410_v11  ;;  %v1448_v12 = vadd.f32 1.0, %v4464_v8 }
 0x536   : >> { %4471 = vrcp.f32 %v1447_v9 }
 0x537   : >> { %4473 = vpow2.f32 %v3276_v13 }
 0x538   : >> { %4475 = vpow2.f32 %v3277_v10 }
 0x539   : >> { %4477 = vrcp.f32 %v1449_v32 }
 0x53a   : >> { %4479 = vrcp.f32 %v1448_v12 }
 0x540   : >> { %v4466_v14 = vpop.eup %4465 }
 0x541   : >> { %v5980_v31 = vpop.eup %4467   ;;  %v1450_v41 = vadd.f32 1.0, %v4466_v14 }
 0x542   : >> { %6502 = vst [vmem:[#allocation31_spill] sm:$0xff] %v5980_v31  ;;  %v6503_v61 = vmov %v5980_v31  ;;  %v4470_v43 = vpop.eup %4469 }
 0x543   : >> { %v5982_v30 = vpop.eup %4471   ;;  %v1486_v34 = vadd.f32 %v6503_v61, %v5883_v36  ;;  %4481 = vrcp.f32 %v1450_v41  ;;  %v1453_v23 = vadd.f32 1.0, %v4470_v43 }
 0x544   : >> { %6504 = vst [vmem:[#allocation32_spill] sm:$0xff] %v5982_v30  ;;  %v6505_v48 = vmov %v5982_v30  ;;  %v4474_v33 = vpop.eup %4473 }
 0x545   : >> { %v1487_v35 = vadd.f32 %v6505_v48, %v5885_v15  ;;  %v1451_v38 = vadd.f32 1.0, %v4474_v33  ;;  %v4476_v42 = vpop.eup %4475 }
 0x546   : >> { %v5988_v20 = vpop.eup %4477   ;;  %v1452_v1 = vadd.f32 1.0, %v4476_v42 }
 0x547   : >> { %v1494_v46 = vpack.c.bf16 %v1487_v35, %v1486_v34  ;;  %6506 = vst [vmem:[#allocation33_spill] sm:$0xff] %v5988_v20  ;;  %v6507_v51 = vmov %v5988_v20  ;;  %4483 = vrcp.f32 %v1451_v38  ;;  %v5990_v31 = vpop.eup %4479   ;;  %v6544_v20 = vmov %v6491_v59 }
 0x548   : >> { %6508 = vst [vmem:[#allocation34_spill] sm:$0xff] %v5990_v31  ;;  %v6509_v52 = vmov %v5990_v31  ;;  %v1489_v36 = vadd.f32 %v6507_v51, %v5893_v39  ;;  %4485 = vrcp.f32 %v1453_v23  ;;  %v6547_v23 = vld [vmem:[#allocation24_spill] sm:$0xff]  ;;  %v4506_v20 = vld [vmem:[#allocation7 + $0x30] sm:$0xff] (%p6050_p9)  }
 0x549   : >> { %1611 = vmatmul.mubr.bf16.vlgmr.msra.gmra.mxu1 %v1494_v46  ;;  %v1488_v15 = vadd.f32 %v6509_v52, %v5891_v37  ;;  %4487 = vrcp.f32 %v1452_v1  ;;  %v4508_v23 = vld [vmem:[#allocation7 + $0x20] sm:$0xff] (%p6050_p9)  }
 0x54a   : >> { %1620 = vmatprep.mubr.bf16.mxu1 %v5386_v21 }
 0x54b   : >> { %v1495_v30 = vpack.c.bf16 %v1489_v36, %v1488_v15 }
 0x550   : >> { %v5998_v27 = vpop.eup %4481  }
 0x551   : >> { %1621 = vmatmul.mubr.bf16.gmra.mxu1 %v1495_v30  ;;  %6510 = vst [vmem:[#allocation35_spill] sm:$0xff] %v5998_v27  ;;  %v6511_v53 = vmov %v5998_v27  ;;  %v6552_v30 = vld [vmem:[#allocation32_spill] sm:$0xff] }
 0x552   : >> { %1630 = vmatprep.mubr.bf16.mxu1 %v5386_v21  ;;  %v1490_v3 = vadd.f32 %v6511_v53, %v5899_v45 }
 0x554   : >> { %v6000_v26 = vpop.eup %4483  }
 0x555   : >> { %6512 = vst [vmem:[#allocation36_spill] sm:$0xff] %v6000_v26  ;;  %v6513_v54 = vmov %v6000_v26  ;;  %v6006_v24 = vpop.eup %4485  }
 0x556   : >> { %v1491_v44 = vadd.f32 %v6513_v54, %v5901_v47  ;;  %6514 = vst [vmem:[#allocation37_spill] sm:$0xff] %v6006_v24  ;;  %v6515_v55 = vmov %v6006_v24  ;;  %v6008_v25 = vpop.eup %4487   ;;  %v4504_v24 = vld [vmem:[#allocation5] sm:$0xff] (%p6050_p9)  }
 0x557   : >> { %6516 = vst [vmem:[#allocation38_spill] sm:$0xff] %v6008_v25  ;;  %v6517_v56 = vmov %v6008_v25  ;;  %v1493_v37 = vadd.f32 %v6515_v55, %v5909_v28  ;;  %v6550_v28 = vld [vmem:[#allocation33_spill] sm:$0xff]  ;;  %v4503_v25 = vld [vmem:[#allocation5 + $0x40] sm:$0xff] (%p6050_p9)  }
 0x558   : >> { %v1496_v39 = vpack.c.bf16 %v1491_v44, %v1490_v3  ;;  %v1492_v27 = vadd.f32 %v6517_v56, %v5907_v29  ;;  %v6551_v29 = vmov %v5990_v31  ;;  %v6553_v31 = vld [vmem:[#allocation31_spill] sm:$0xff]  ;;  %v4499_v28 = vld [vmem:[#allocation5 + $0x50] sm:$0xff] (%p6050_p9)  }
 0x559   : > { %v4498_v29 = vld [vmem:[#allocation5 + $0x18] sm:$0xff] (%p6050_p9)  }
 0x55a   : >> { %1631 = vmatmul.mubr.bf16.gmra.mxu1 %v1496_v39  ;;  %v1497_v26 = vpack.c.bf16 %v1493_v37, %v1492_v27  ;;  %v6549_v27 = vld [vmem:[#allocation35_spill] sm:$0xff]  ;;  %v4509_v31 = vld [vmem:[#allocation7 + $0x18] sm:$0xff] (%p6050_p9)  }
 0x55b   : >> { %1640 = vmatprep.mubr.bf16.mxu1 %v5386_v21  ;;  %v6545_v21 = vmov %v6487_v57 }
 0x562   : >> { %1641 = vmatmul.mubr.bf16.gmra.mxu1 %v1497_v26  ;;  %v6548_v26 = vld [vmem:[#allocation36_spill] sm:$0xff] }
 0x609   : >> { %v6015_v47 = vpop.f32.mrf.mxu1  }
 0x60a   : >> { %6518 = vst [vmem:[#allocation39_spill] sm:$0xff] %v6015_v47  ;;  %v6574_v62 = vmov %v6015_v47  ;;  %v4497_v47 = vld [vmem:[#allocation5 + $0x58] sm:$0xff] (%p6050_p9)  }
 0x60b   : >> { %v6017_v46 = vpop.f32.mrf.mxu1  }
 0x60c   : >> { %6519 = vst [vmem:[#allocation40_spill] sm:$0xff] %v6017_v46  ;;  %v6573_v50 = vmov %v6017_v46  ;;  %v4505_v46 = vld [vmem:[#allocation7 + $0x38] sm:$0xff] (%p6050_p9)  }
 0x60d   : >> { %v6019_v45 = vpop.f32.mrf.mxu1   ;;  %3677 = vmatprep.subr.bf16.mxu1 (%p6050_p9), %v4505_v46 }
 0x60e   : >> { %6520 = vst [vmem:[#allocation41_spill] sm:$0xff] %v6019_v45  ;;  %v6572_v49 = vmov %v6019_v45  ;;  %v4496_v45 = vld [vmem:[#allocation5 + $0x20] sm:$0xff] (%p6050_p9)   ;;  %3678 = vmatpush3.bf16.msra.mxu1 (%p6050_p9), %v4505_v46  ;;  %v6610_v46 = vld [vmem:[#allocation34_spill] sm:$0xff] (%p6050_p9) }
 0x60f   : >> { %v6021_v44 = vpop.f32.mrf.mxu1   ;;  %3679 = vmatprep.subr.bf16.mxu1 (%p6050_p9), %v4506_v20 }
 0x610   : >> { %6521 = vst [vmem:[#allocation42_spill] sm:$0xff] %v6021_v44  ;;  %v6571_v1 = vmov %v6021_v44 }
 0x611   : >> { %v6023_v43 = vpop.f32.mrf.mxu1   ;;  %v6592_v3 = vmov %v6571_v1  ;;  %v6594_v1 = vmov %v6573_v50  ;;  %v4492_v50 = vld [vmem:[#allocation5 + $0x30] sm:$0xff] (%p6050_p9)   ;;  %v6599_v22 = vld [vmem:[#allocation39_spill] sm:$0xff] (%p6050_p9) }
 0x612   : >> { %6522 = vst [vmem:[#allocation43_spill] sm:$0xff] %v6023_v43  ;;  %v6570_v2 = vmov %v6023_v43  ;;  %v1683_v21 = vadd.f32 (%p6050_p9), %v6599_v22, %v6599_v22  ;;  %3680 = vmatpush3.bf16.msra.mxu1 (%p6050_p9), %v4506_v20 }
 0x613   : >> { %v6025_v42 = vpop.f32.mrf.mxu1   ;;  %v6591_v4 = vmov %v6570_v2  ;;  %v6593_v2 = vmov %v6572_v49  ;;  %v6597_v63 = vld [vmem:[#allocation40_spill] sm:$0xff] (%p6050_p9)  ;;  %v4491_v49 = vld [vmem:[#allocation5 + $0x70] sm:$0xff] (%p6050_p9)  }
 0x614   : >> { %6523 = vst [vmem:[#allocation44_spill] sm:$0xff] %v6025_v42  ;;  %v6569_v0 = vmov %v6025_v42  ;;  %v1684_v57 = vadd.f32 (%p6050_p9), %v6597_v63, %v6597_v63  ;;  %v4501_v63 = vld [vmem:[#allocation5 + $0x48] sm:$0xff] (%p6050_p9)  }
 0x615   : >> { %v6027_v41 = vpop.f32.mrf.mxu1   ;;  %v6590_v5 = vmov %v6569_v0  ;;  %v6595_v0 = vmov %v6574_v62  ;;  %v4493_v62 = vld [vmem:[#allocation5 + $0x68] sm:$0xff] (%p6050_p9)   ;;  %v6600_v16 = vld [vmem:[#allocation41_spill] sm:$0xff] (%p6050_p9) }
 0x616   : >> { %v6524_v58 = vmov %v6027_v41  ;;  %v4489_v0 = vld [vmem:[#allocation5 + $0x78] sm:$0xff] (%p6050_p9)   ;;  %v1685_v19 = vadd.f32 (%p6050_p9), %v6600_v16, %v6600_v16 }
 0x617   : >> { %v6029_v40 = vpop.f32.mrf.mxu1   ;;  %v6568_v41 = vmov %v6524_v58  ;;  %v6589_v6 = vmov %v6524_v58  ;;  %v6598_v59 = vld [vmem:[#allocation42_spill] sm:$0xff] (%p6050_p9)  ;;  %3493 = vmatprep.subr.bf16.mxu0 (%p6050_p9), %v4489_v0 }
 0x618   : >> { %v6525_v55 = vmov %v6029_v40 }
 0x619   : >> { %v6567_v40 = vmov %v6525_v55  ;;  %v6588_v7 = vmov %v6525_v55  ;;  %v1690_v5 = vadd.f32 (%p6050_p9), %v6525_v55, %v6525_v55  ;;  %v6602_v6 = vld [vmem:[#allocation43_spill] sm:$0xff] (%p6050_p9) }
 0x61a   : >> { %v6031_v39 = vpop.f32.mrf.mxu1   ;;  %v1699_v7 = vpack.c.bf16 (%p6050_p9), %v1685_v19, %v1683_v21  ;;  %v1687_v40 = vadd.f32 (%p6050_p9), %v6602_v6, %v6602_v6 }
 0x61b   : >> { %v6526_v56 = vmov %v6031_v39  ;;  %v6601_v18 = vld [vmem:[#allocation44_spill] sm:$0xff] (%p6050_p9) }
 0x61c   : >> { %v6033_v38 = vpop.f32.mrf.mxu1   ;;  %v6566_v39 = vmov %v6526_v56  ;;  %v6587_v8 = vmov %v6526_v56  ;;  %v1688_v17 = vadd.f32 (%p6050_p9), %v6601_v18, %v6601_v18 }
 0x61d   : >> { %v6527_v60 = vmov %v6033_v38 }
 0x61e   : >> { %v6035_v37 = vpop.f32.mrf.mxu1   ;;  %v6565_v38 = vmov %v6527_v60  ;;  %v6586_v9 = vmov %v6527_v60  ;;  %v1702_v4 = vpack.c.bf16 (%p6050_p9), %v1690_v5, %v1688_v17 }
 0x61f   : >> { %6528 = vst [vmem:[#allocation45_spill] sm:$0xff] %v6035_v37  ;;  %v6563_v61 = vmov %v6035_v37  ;;  %v1689_v9 = vadd.f32 (%p6050_p9), %v6524_v58, %v6524_v58 }
 0x620   : >> { %v6037_v36 = vpop.f32.mrf.mxu1   ;;  %v6564_v37 = vmov %v6563_v61 }
 0x621   : >> { %v6530_v48 = vmov %v6037_v36  ;;  %v6584_v61 = vmov %v6564_v37 }
 0x622   : >> { %v6039_v35 = vpop.f32.mrf.mxu1   ;;  %v6562_v36 = vmov %v6530_v48  ;;  %v6583_v11 = vmov %v6530_v48  ;;  %v6585_v10 = vmov %v6584_v61  ;;  %v4495_v61 = vld [vmem:[#allocation5 + $0x60] sm:$0xff] (%p6050_p9)   ;;  %v1694_v8 = vadd.f32 (%p6050_p9), %v6530_v48, %v6530_v48 }
 0x623   : >> { %6531 = vst [vmem:[#allocation46_spill] sm:$0xff] %v6039_v35  ;;  %v6560_v52 = vmov %v6039_v35  ;;  %v1692_v11 = vadd.f32 (%p6050_p9), %v6527_v60, %v6527_v60  ;;  %v1701_v10 = vpack.c.bf16 (%p6050_p9), %v1689_v9, %v1687_v40  ;;  %v4511_v36 = vld [vmem:[#allocation7 + $0x8] sm:$0xff] (%p6050_p9)  }
 0x624   : >> { %v6041_v34 = vpop.f32.mrf.mxu1   ;;  %v6561_v35 = vmov %v6560_v52 }
 0x625   : >> { %6533 = vst [vmem:[#allocation47_spill] sm:$0xff] %v6041_v34  ;;  %v6558_v51 = vmov %v6041_v34  ;;  %v6581_v52 = vmov %v6561_v35 }
 0x626   : >> { %v6043_v33 = vpop.f32.mrf.mxu1   ;;  %v6559_v34 = vmov %v6558_v51  ;;  %v6582_v12 = vmov %v6581_v52  ;;  %v4490_v52 = vld [vmem:[#allocation5 + $0x38] sm:$0xff] (%p6050_p9)  }
 0x627   : >> { %6535 = vst [vmem:[#allocation48_spill] sm:$0xff] %v6043_v33  ;;  %v6556_v53 = vmov %v6043_v33  ;;  %v6579_v51 = vmov %v6559_v34  ;;  %3494 = vmatpush3.bf16.msra.mxu0 (%p6050_p9), %v4490_v52  ;;  %v6603_v12 = vld [vmem:[#allocation45_spill] sm:$0xff] (%p6050_p9) }
 0x628   : >> { %v6045_v32 = vpop.f32.mrf.mxu1   ;;  %v6557_v33 = vmov %v6556_v53  ;;  %v6580_v13 = vmov %v6579_v51  ;;  %447 = sbr.rel (!%p6050_p9) target bundleno = 162 (0xa2), region = 141  ;;  %3495 = vmatprep.subr.bf16.mxu0 (%p6050_p9), %v4491_v49  ;;  %v4494_v51 = vld [vmem:[#allocation5 + $0x28] sm:$0xff] (%p6050_p9)   ;;  %v4510_v52 = vld [vmem:[#allocation7 + $0x10] sm:$0xff] (%p6050_p9)  }
 0x629   : >> { %6537 = vst [vmem:[#allocation49_spill] sm:$0xff] %v6045_v32  ;;  %v6554_v54 = vmov %v6045_v32  ;;  %v6577_v53 = vmov %v6557_v33  ;;  %v1704_v13 = vpack.c.bf16 (%p6050_p9), %v1694_v8, %v1692_v11 }
 0x62a   : >> { %v6555_v32 = vmov %v6554_v54  ;;  %v6578_v14 = vmov %v6577_v53  ;;  %v1686_v53 = vadd.f32 (%p6050_p9), %v6598_v59, %v6598_v59  ;;  %v4500_v59 = vld [vmem:[#allocation5 + $0x10] sm:$0xff] (%p6050_p9)   ;;  %v6606_v48 = vld [vmem:[#allocation46_spill] sm:$0xff] (%p6050_p9) }
 0x62b   : >> { %v6575_v54 = vmov %v6555_v32  ;;  %3496 = vmatpush3.bf16.msra.mxu0 (%p6050_p9), %v4492_v50  ;;  %v1691_v32 = vadd.f32 (%p6050_p9), %v6526_v56, %v6526_v56  ;;  %v1693_v14 = vadd.f32 (%p6050_p9), %v6603_v12, %v6603_v12  ;;  %v1695_v34 = vadd.f32 (%p6050_p9), %v6606_v48, %v6606_v48 }
 0x62c   : >> { %v6576_v15 = vmov %v6575_v54  ;;  %v1700_v54 = vpack.c.bf16 (%p6050_p9), %v1686_v53, %v1684_v57  ;;  %3497 = vmatprep.subr.bf16.mxu0 (%p6050_p9), %v4493_v62  ;;  %v4502_v57 = vld [vmem:[#allocation5 + $0x8] sm:$0xff] (%p6050_p9)  }
 0x62d   : > { %v1703_v60 = vpack.c.bf16 %v1693_v14, %v1691_v32  ;;  %v4512_v15 = vld [vmem:[#allocation7] sm:$0xff]  }
 0x62e   : > { %1835 = vmatprep.mubr.bf16.mxu0 %v1700_v54  ;;  %v6607_v35 = vld [vmem:[#allocation48_spill] sm:$0xff] }
 0x62f   : > { %3498 = vmatpush3.bf16.msra.mxu0 %v4494_v51  ;;  %v1697_v38 = vadd.f32 %v6607_v35, %v6607_v35  ;;  %v4507_v51 = vld [vmem:[#allocation7 + $0x28] sm:$0xff]  }
 0x630   : > { %3499 = vmatprep.subr.bf16.mxu0 %v4495_v61  ;;  %v6604_v61 = vld [vmem:[#allocation47_spill] sm:$0xff]  ;;  %v6605_v41 = vld [vmem:[#allocation49_spill] sm:$0xff]  ;;  %3681 = vmatprep.subr.bf16.mxu1 %v4507_v51 }
 0x631   : > { %v1696_v58 = vadd.f32 %v6604_v61, %v6604_v61  ;;  %v1698_v43 = vadd.f32 %v6605_v41, %v6605_v41  ;;  %v1705_v42 = vpack.c.bf16 %v1697_v38, %v1695_v34  ;;  %3682 = vmatpush3.bf16.msra.mxu1 %v4507_v51  ;;  %v6608_v61 = vld [vmem:[#allocation31_spill] sm:$0xff]  ;;  %v6609_v41 = vld [vmem:[#allocation32_spill] sm:$0xff]  ;;  %v6611_v51 = vld [vmem:[#allocation33_spill] sm:$0xff] }
 0x632   : > { %3683 = vmatprep.subr.bf16.mxu1 %v4508_v23 }
 0x633   : > { %3500 = vmatpush3.bf16.msra.mxu0 %v4496_v45  ;;  %v1706_v33 = vpack.c.bf16 %v1698_v43, %v1696_v58 }
 0x634   : > { %3501 = vmatprep.subr.bf16.mxu0 %v4497_v47 }
 0x635   : > { %3684 = vmatpush3.bf16.msra.mxu1 %v4508_v23 }
 0x636   : > { %3685 = vmatprep.subr.bf16.mxu1 %v4509_v31 }
 0x637   : > { %3502 = vmatpush3.bf16.msra.mxu0 %v4498_v29 }
 0x638   : > { %3503 = vmatprep.subr.bf16.mxu0 %v4499_v28 }
 0x639   : > { %3686 = vmatpush3.bf16.msra.mxu1 %v4509_v31 }
 0x63a   : > { %3687 = vmatprep.subr.bf16.mxu1 %v4510_v52 }
 0x63b   : > { %3504 = vmatpush3.bf16.msra.mxu0 %v4500_v59 }
 0x63c   : > { %3505 = vmatprep.subr.bf16.mxu0 %v4501_v63 }
 0x63d   : > { %3688 = vmatpush3.bf16.msra.mxu1 %v4510_v52 }
 0x63e   : > { %3689 = vmatprep.subr.bf16.mxu1 %v4511_v36 }
 0x63f   : > { %3506 = vmatpush3.bf16.msra.mxu0 %v4502_v57 }
 0x640   : > { %3507 = vmatprep.subr.bf16.mxu0 %v4503_v25 }
 0x641   : > { %3690 = vmatpush3.bf16.msra.mxu1 %v4511_v36 }
 0x642   : > { %3691 = vmatprep.subr.bf16.mxu1 %v4512_v15 }
 0x643   : > { %3508 = vmatpush3.bf16.msra.mxu0 %v4504_v24 }
 0x645   : > { %3692 = vmatpush3.bf16.msra.mxu1 %v4512_v15 }
 0x646   : > { %1836 = vmatmul.mubr.bf16.vlgmr.msra.gmra.mxu0 %v1699_v7 }
 0x647   : > { %1843 = vmatprep.mubr.bf16.mxu0 %v1702_v4 }
 0x64e   : > { %1844 = vmatmul.mubr.bf16.gmra.mxu0 %v1701_v10 }
 0x64f   : > { %1851 = vmatprep.mubr.bf16.mxu0 %v1704_v13 }
 0x656   : > { %1852 = vmatmul.mubr.bf16.gmra.mxu0 %v1703_v60 }
 0x657   : > { %1859 = vmatprep.mubr.bf16.mxu0 %v1706_v33 }
 0x65e   : > { %1860 = vmatmul.mubr.bf16.gmra.mxu0 %v1705_v42 }
 0x706   : > { %v3509_v30 = vpop.f32.mrf.mxu0 }
 0x708   : > { %v3510_v53 = vpop.f32.mrf.mxu0 }
 0x709   : > { %v3511_v54 = vadd.f32 %v3510_v53, %v3509_v30  ;;  %v6612_v30 = vld [vmem:[#allocation35_spill] sm:$0xff] }
 0x70a   : > { %v3512_v3 = vpop.f32.mrf.mxu0 }
 0x70b   : > { %v3311_v44 = vmul.f32 -1.442695, %v3511_v54  ;;  %v6613_v54 = vld [vmem:[#allocation36_spill] sm:$0xff] }
 0x70c   : > { %v3513_v39 = vpop.f32.mrf.mxu0 }
 0x70d   : > { %4561 = vpow2.f32 %v3311_v44  ;;  %v3514_v55 = vadd.f32 %v3513_v39, %v3512_v3 }
 0x70e   : > { %v3515_v56 = vpop.f32.mrf.mxu0 }
 0x70f   : > { %v3312_v37 = vmul.f32 -1.442695, %v3514_v55 }
 0x710   : > { %v3516_v27 = vpop.f32.mrf.mxu0 }
 0x711   : > { %4563 = vpow2.f32 %v3312_v37  ;;  %v3517_v26 = vadd.f32 %v3516_v27, %v3515_v56  ;;  %v6614_v56 = vld [vmem:[#allocation38_spill] sm:$0xff]  ;;  %v6615_v27 = vld [vmem:[#allocation37_spill] sm:$0xff] }
 0x712   : > { %v3518_v2 = vpop.f32.mrf.mxu0 }
 0x713   : > { %v3313_v1 = vmul.f32 -1.442695, %v3517_v26 }
 0x714   : > { %v3519_v0 = vpop.f32.mrf.mxu0 }
 0x715   : > { %4565 = vpow2.f32 %v3313_v1  ;;  %v3520_v49 = vadd.f32 %v3519_v0, %v3518_v2  ;;  %v4513_v1 = vld [vmem:[#allocation8 + $0x38] sm:$0xff]   ;;  %v4514_v0 = vld [vmem:[#allocation8 + $0x30] sm:$0xff]  }
 0x716   : > { %v3521_v50 = vpop.f32.mrf.mxu0  ;;  %3701 = vmatprep.subr.bf16.mxu0 %v4513_v1 }
 0x717   : > { %v3314_v62 = vmul.f32 -1.442695, %v3520_v49  ;;  %3702 = vmatpush3.bf16.msra.mxu0 %v4513_v1  ;;  %v4515_v49 = vld [vmem:[#allocation8 + $0x28] sm:$0xff]  }
 0x718   : > { %v3522_v45 = vpop.f32.mrf.mxu0  ;;  %3703 = vmatprep.subr.bf16.mxu0 %v4514_v0 }
 0x719   : > { %4567 = vpow2.f32 %v3314_v62  ;;  %v3523_v47 = vadd.f32 %v3522_v45, %v3521_v50  ;;  %v4516_v50 = vld [vmem:[#allocation8 + $0x20] sm:$0xff]   ;;  %v4517_v62 = vld [vmem:[#allocation8 + $0x18] sm:$0xff]   ;;  %v4518_v45 = vld [vmem:[#allocation8 + $0x10] sm:$0xff]  }
 0x71a   : > { %v4562_v29 = vpop.eup %4561  ;;  %v3524_v28 = vpop.f32.mrf.mxu0 }
 0x71b   : > { %v1892_v59 = vadd.f32 1.0, %v4562_v29  ;;  %v3315_v63 = vmul.f32 -1.442695, %v3523_v47  ;;  %3704 = vmatpush3.bf16.msra.mxu0 %v4514_v0  ;;  %v4519_v47 = vld [vmem:[#allocation8 + $0x8] sm:$0xff]   ;;  %v4520_v29 = vld [vmem:[#allocation8] sm:$0xff]  }
 0x71c   : > { %v3525_v57 = vpop.f32.mrf.mxu0  ;;  %3705 = vmatprep.subr.bf16.mxu0 %v4515_v49 }
 0x71d   : > { %v3526_v25 = vadd.f32 %v3525_v57, %v3524_v28  ;;  %4569 = vpow2.f32 %v3315_v63  ;;  %v4521_v28 = vld [vmem:[#allocation13 + $0x38] sm:$0xff]   ;;  %v4523_v63 = vld [vmem:[#allocation13 + $0x28] sm:$0xff]   ;;  %v4524_v57 = vld [vmem:[#allocation13 + $0x20] sm:$0xff]  }
 0x71e   : > { %v4564_v24 = vpop.eup %4563  ;;  %v3527_v22 = vpop.f32.mrf.mxu0  ;;  %4571 = vrcp.f32 %v1892_v59  ;;  %v4522_v59 = vld [vmem:[#allocation13 + $0x30] sm:$0xff]   ;;  %3725 = vmatprep.subr.bf16.mxu1 %v4521_v28 }
 0x71f   : > { %v1893_v21 = vadd.f32 1.0, %v4564_v24  ;;  %v3316_v16 = vmul.f32 -1.442695, %v3526_v25  ;;  %3706 = vmatpush3.bf16.msra.mxu0 %v4515_v49  ;;  %v4525_v25 = vld [vmem:[#allocation13 + $0x18] sm:$0xff]  }
 0x720   : > { %v3528_v19 = vpop.f32.mrf.mxu0  ;;  %3707 = vmatprep.subr.bf16.mxu0 %v4516_v50 }
 0x721   : > { %4573 = vrcp.f32 %v1893_v21  ;;  %v3529_v18 = vadd.f32 %v3528_v19, %v3527_v22 }
 0x722   : > { %v4566_v17 = vpop.eup %4565  ;;  %4575 = vpow2.f32 %v3316_v16  ;;  %v3530_v5 = vpop.f32.mrf.mxu0 }
 0x723   : > { %v1894_v7 = vadd.f32 1.0, %v4566_v17  ;;  %v3317_v4 = vmul.f32 -1.442695, %v3529_v18  ;;  %3708 = vmatpush3.bf16.msra.mxu0 %v4516_v50 }
 0x724   : > { %v3531_v6 = vpop.f32.mrf.mxu0  ;;  %3709 = vmatprep.subr.bf16.mxu0 %v4517_v62 }
 0x725   : > { %v3532_v40 = vadd.f32 %v3531_v6, %v3530_v5  ;;  %4577 = vpow2.f32 %v3317_v4 }
 0x726   : > { %v4568_v9 = vpop.eup %4567  ;;  %4579 = vrcp.f32 %v1894_v7 }
 0x727   : > { %v1895_v11 = vadd.f32 1.0, %v4568_v9  ;;  %v3318_v8 = vmul.f32 -1.442695, %v3532_v40  ;;  %3710 = vmatpush3.bf16.msra.mxu0 %v4517_v62 }
 0x728   : > { %3711 = vmatprep.subr.bf16.mxu0 %v4518_v45 }
 0x729   : > { %4581 = vrcp.f32 %v1895_v11 }
 0x72a   : > { %4583 = vpow2.f32 %v3318_v8  ;;  %v4570_v10 = vpop.eup %4569 }
 0x72b   : > { %v6236_v13 = vpop.eup %4571  ;;  %v1896_v32 = vadd.f32 1.0, %v4570_v10  ;;  %3712 = vmatpush3.bf16.msra.mxu0 %v4518_v45 }
 0x72c   : > { %v1932_v58 = vadd.f32 %v6236_v13, %v6608_v61  ;;  %3713 = vmatprep.subr.bf16.mxu0 %v4519_v47 }
 0x72d   : > { %4585 = vrcp.f32 %v1896_v32 }
 0x72e   : > { %v6238_v12 = vpop.eup %4573 }
 0x72f   : > { %v4576_v14 = vpop.eup %4575  ;;  %v1933_v43 = vadd.f32 %v6238_v12, %v6609_v41  ;;  %3714 = vmatpush3.bf16.msra.mxu0 %v4519_v47 }
 0x730   : > { %v1897_v60 = vadd.f32 1.0, %v4576_v14  ;;  %3715 = vmatprep.subr.bf16.mxu0 %v4520_v29 }
 0x731   : > { %v1940_v33 = vpack.c.bf16 %v1933_v43, %v1932_v58 }
 0x732   : > { %4587 = vrcp.f32 %v1897_v60  ;;  %v4578_v48 = vpop.eup %4577 }
 0x733   : > { %3693 = vmatprep.mubr.bf16.mxu1 %v1940_v33  ;;  %v6244_v34 = vpop.eup %4579  ;;  %v1898_v35 = vadd.f32 1.0, %v4578_v48  ;;  %3716 = vmatpush3.bf16.msra.mxu0 %v4520_v29  ;;  %v6620_v29 = vld [vmem:[#allocation28_spill] sm:$0xff] }
 0x734   : > { %v1934_v20 = vadd.f32 %v6244_v34, %v6610_v46 }
 0x735   : > { %4589 = vrcp.f32 %v1898_v35 }
 0x736   : > { %v6246_v38 = vpop.eup %4581 }
 0x737   : > { %v4584_v42 = vpop.eup %4583  ;;  %v1935_v23 = vadd.f32 %v6246_v38, %v6611_v51 }
 0x738   : > { %v1899_v31 = vadd.f32 1.0, %v4584_v42 }
 0x739   : > { %v1941_v52 = vpack.c.bf16 %v1935_v23, %v1934_v20 }
 0x73a   : > { %4591 = vrcp.f32 %v1899_v31  ;;  %v6252_v36 = vpop.eup %4585 }
 0x73b   : > { %3694 = vmatmul.mubr.bf16.vlgmr.msra.gmra.mxu1 %v1941_v52  ;;  %v1936_v53 = vadd.f32 %v6252_v36, %v6612_v30 }
 0x73c   : > { %3726 = vmatpush3.bf16.msra.mxu1 %v4521_v28 }
 0x73d   : > { %3727 = vmatprep.subr.bf16.mxu1 %v4522_v59 }
 0x73f   : > { %v6254_v15 = vpop.eup %4587 }
 0x740   : > { %v1937_v3 = vadd.f32 %v6254_v15, %v6613_v54  ;;  %3728 = vmatpush3.bf16.msra.mxu1 %v4522_v59  ;;  %v6621_v59 = vld [vmem:[#allocation27_spill] sm:$0xff] }
 0x741   : > { %3729 = vmatprep.subr.bf16.mxu1 %v4523_v63 }
 0x742   : > { %v1942_v44 = vpack.c.bf16 %v1937_v3, %v1936_v53  ;;  %v6260_v39 = vpop.eup %4589  ;;  %v6616_v53 = vld [vmem:[#allocation25_spill] sm:$0xff] }
 0x743   : > { %v1938_v37 = vadd.f32 %v6260_v39, %v6614_v56 }
 0x744   : > { %3697 = vmatprep.mubr.bf16.mxu1 %v1942_v44  ;;  %3730 = vmatpush3.bf16.msra.mxu1 %v4523_v63  ;;  %v6617_v44 = vld [vmem:[#allocation24_spill] sm:$0xff] }
 0x745   : > { %3731 = vmatprep.subr.bf16.mxu1 %v4524_v57 }
 0x747   : > { %v6262_v55 = vpop.eup %4591 }
 0x748   : > { %v1939_v26 = vadd.f32 %v6262_v55, %v6615_v27  ;;  %3732 = vmatpush3.bf16.msra.mxu1 %v4524_v57  ;;  %v6622_v57 = vld [vmem:[#allocation30_spill] sm:$0xff] }
 0x749   : > { %3733 = vmatprep.subr.bf16.mxu1 %v4525_v25 }
 0x74a   : > { %v1943_v2 = vpack.c.bf16 %v1939_v26, %v1938_v37  ;;  %v6618_v37 = vld [vmem:[#allocation26_spill] sm:$0xff] }
 0x74c   : > { %3698 = vmatmul.mubr.bf16.gmra.mxu1 %v1943_v2  ;;  %v6619_v2 = vld [vmem:[#allocation23_spill] sm:$0xff] }
 0x74d   : > { %3734 = vmatpush3.bf16.msra.mxu1 %v4525_v25 }
 0x7fb   : > { %v3695_v24 = vpop.f32.mrf.mxu1 }
 0x7fc   : > { %v3329_v22 = vmul.f32 -1.442695, %v3695_v24  ;;  %v6623_v24 = vld [vmem:[#allocation29_spill] sm:$0xff] }
 0x7fd   : > { %v2026_v21 = vpop.f32.mrf.mxu1 }
 0x7fe   : > { %4593 = vpow2.f32 %v3329_v22  ;;  %v3327_v16 = vmul.f32 -1.442695, %v2026_v21 }
 0x7ff   : > { %v3696_v19 = vpop.f32.mrf.mxu1 }
 0x800   : > { %4595 = vpow2.f32 %v3327_v16  ;;  %v3330_v18 = vmul.f32 -1.442695, %v3696_v19  ;;  %v4526_v19 = vld [vmem:[#allocation13 + $0x10] sm:$0xff]  }
 0x801   : > { %v2029_v17 = vpop.f32.mrf.mxu1  ;;  %3735 = vmatprep.subr.bf16.mxu1 %v4526_v19 }
 0x802   : > { %4597 = vpow2.f32 %v3330_v18  ;;  %v3328_v5 = vmul.f32 -1.442695, %v2029_v17  ;;  %3736 = vmatpush3.bf16.msra.mxu1 %v4526_v19  ;;  %v4527_v18 = vld [vmem:[#allocation13 + $0x8] sm:$0xff]   ;;  %v4528_v17 = vld [vmem:[#allocation13] sm:$0xff]  }
 0x803   : > { %3737 = vmatprep.subr.bf16.mxu1 %v4527_v18 }
 0x804   : > { %4599 = vpow2.f32 %v3328_v5 }
 0x806   : > { %3738 = vmatpush3.bf16.msra.mxu1 %v4527_v18 }
 0x807   : > { %3739 = vmatprep.subr.bf16.mxu1 %v4528_v17 }
 0x80a   : > { %3740 = vmatpush3.bf16.msra.mxu1 %v4528_v17 }
 0x80b   : > { %v4594_v7 = vpop.eup %4593 }
 0x80c   : > { %v2083_v4 = vadd.f32 1.0, %v4594_v7  ;;  %v3699_v6 = vpop.f32.mrf.mxu1 }
 0x80d   : > { %v4596_v40 = vpop.eup %4595  ;;  %v3333_v9 = vmul.f32 -1.442695, %v3699_v6 }
 0x80e   : > { %4601 = vrcp.f32 %v2083_v4  ;;  %v2081_v11 = vadd.f32 1.0, %v4596_v40  ;;  %v2042_v8 = vpop.f32.mrf.mxu1 }
 0x80f   : > { %v4598_v10 = vpop.eup %4597  ;;  %4603 = vpow2.f32 %v3333_v9  ;;  %v3331_v32 = vmul.f32 -1.442695, %v2042_v8 }
 0x810   : > { %4605 = vrcp.f32 %v2081_v11  ;;  %v2084_v14 = vadd.f32 1.0, %v4598_v10  ;;  %v3700_v61 = vpop.f32.mrf.mxu1 }
 0x811   : > { %v4600_v58 = vpop.eup %4599  ;;  %4607 = vpow2.f32 %v3331_v32  ;;  %v3334_v41 = vmul.f32 -1.442695, %v3700_v61 }
 0x812   : > { %4609 = vrcp.f32 %v2084_v14  ;;  %v2082_v43 = vadd.f32 1.0, %v4600_v58  ;;  %v2045_v60 = vpop.f32.mrf.mxu1 }
 0x813   : > { %4611 = vpow2.f32 %v3334_v41  ;;  %v3332_v33 = vmul.f32 -1.442695, %v2045_v60 }
 0x814   : > { %4613 = vrcp.f32 %v2082_v43 }
 0x815   : > { %4615 = vpow2.f32 %v3332_v33 }
 0x81b   : > { %v6268_v48 = vpop.eup %4601 }
 0x81c   : > { %v4604_v35 = vpop.eup %4603  ;;  %v2123_v1 = vadd.f32 %v6268_v48, %v6619_v2 }
 0x81d   : > { %v6270_v42 = vpop.eup %4605  ;;  %v2087_v31 = vadd.f32 1.0, %v4604_v35 }
 0x81e   : > { %v4608_v46 = vpop.eup %4607  ;;  %v2121_v56 = vadd.f32 %v6270_v42, %v6617_v44  ;;  %v4535_v44 = vld [vmem:[#allocation11 + $0x8] sm:$0xff]  }
 0x81f   : > { %v6272_v20 = vpop.eup %4609  ;;  %v2085_v51 = vadd.f32 1.0, %v4608_v46 }
 0x820   : > { %v4612_v23 = vpop.eup %4611  ;;  %v2124_v54 = vadd.f32 %v6272_v20, %v6616_v53  ;;  %v4532_v53 = vld [vmem:[#allocation11 + $0x20] sm:$0xff]  }
 0x821   : > { %v6274_v52 = vpop.eup %4613  ;;  %v2088_v30 = vadd.f32 1.0, %v4612_v23  ;;  %4617 = vrcp.f32 %v2085_v51  ;;  %v4529_v23 = vld [vmem:[#allocation11 + $0x38] sm:$0xff]  }
 0x822   : > { %v4616_v3 = vpop.eup %4615  ;;  %v2122_v27 = vadd.f32 %v6274_v52, %v6618_v37  ;;  %v2130_v49 = vpack.c.bf16 %v2124_v54, %v2123_v1  ;;  %3749 = vmatprep.subr.bf16.mxu0 %v4529_v23  ;;  %v4533_v54 = vld [vmem:[#allocation11 + $0x18] sm:$0xff]  }
 0x823   : > { %4619 = vrcp.f32 %v2088_v30  ;;  %v2086_v26 = vadd.f32 1.0, %v4616_v3  ;;  %v4531_v30 = vld [vmem:[#allocation11 + $0x28] sm:$0xff]   ;;  %v4534_v3 = vld [vmem:[#allocation11 + $0x10] sm:$0xff]  }
 0x824   : > { %4621 = vrcp.f32 %v2087_v31  ;;  %v2129_v0 = vpack.c.bf16 %v2122_v27, %v2121_v56  ;;  %v4530_v31 = vld [vmem:[#allocation11 + $0x30] sm:$0xff]   ;;  %v4536_v56 = vld [vmem:[#allocation11] sm:$0xff]  }
 0x825   : > { %4623 = vrcp.f32 %v2086_v26 }
 0x826   : > { %3717 = vmatprep.mubr.bf16.mxu0 %v2129_v0 }
 0x827   : > { %3718 = vmatmul.mubr.bf16.vlgmr.msra.gmra.mxu0 %v2130_v49 }
 0x828   : > { %3750 = vmatpush3.bf16.msra.mxu0 %v4529_v23 }
 0x829   : > { %3751 = vmatprep.subr.bf16.mxu0 %v4530_v31 }
 0x82c   : > { %3752 = vmatpush3.bf16.msra.mxu0 %v4530_v31 }
 0x82d   : > { %3753 = vmatprep.subr.bf16.mxu0 %v4531_v30 }
 0x82e   : > { %v6284_v50 = vpop.eup %4617 }
 0x82f   : > { %v2125_v63 = vadd.f32 %v6284_v50, %v6621_v59 }
 0x830   : > { %v6286_v62 = vpop.eup %4619  ;;  %3754 = vmatpush3.bf16.msra.mxu0 %v4531_v30 }
 0x831   : > { %v6288_v45 = vpop.eup %4621  ;;  %v2128_v28 = vadd.f32 %v6286_v62, %v6620_v29  ;;  %3755 = vmatprep.subr.bf16.mxu0 %v4532_v53 }
 0x832   : > { %v6290_v47 = vpop.eup %4623  ;;  %v2127_v22 = vadd.f32 %v6288_v45, %v6623_v24 }
 0x833   : > { %v2126_v25 = vadd.f32 %v6290_v47, %v6622_v57 }
 0x834   : > { %v2132_v16 = vpack.c.bf16 %v2128_v28, %v2127_v22  ;;  %3756 = vmatpush3.bf16.msra.mxu0 %v4532_v53 }
 0x835   : > { %v2131_v21 = vpack.c.bf16 %v2126_v25, %v2125_v63  ;;  %3757 = vmatprep.subr.bf16.mxu0 %v4533_v54 }
 0x837   : > { %3721 = vmatprep.mubr.bf16.mxu0 %v2131_v21 }
 0x838   : > { %3722 = vmatmul.mubr.bf16.gmra.mxu0 %v2132_v16 }
 0x839   : > { %3758 = vmatpush3.bf16.msra.mxu0 %v4533_v54 }
 0x83a   : > { %3759 = vmatprep.subr.bf16.mxu0 %v4534_v3 }
 0x83d   : > { %3760 = vmatpush3.bf16.msra.mxu0 %v4534_v3 }
 0x83e   : > { %3761 = vmatprep.subr.bf16.mxu0 %v4535_v44 }
 0x841   : > { %3762 = vmatpush3.bf16.msra.mxu0 %v4535_v44 }
 0x842   : > { %3763 = vmatprep.subr.bf16.mxu0 %v4536_v56 }
 0x845   : > { %3764 = vmatpush3.bf16.msra.mxu0 %v4536_v56 }
 0x8e7   : > { %v3719_v5 = vpop.f32.mrf.mxu0 }
 0x8e8   : > { %2807 = vst [vmem:[%s5654_s23 + $0x10] sm:$0xff] %v3719_v5  ;;  %v2264_v8 = vadd.f32 %v3719_v5, %v3719_v5 }
 0x8e9   : > { %v2215_v7 = vpop.f32.mrf.mxu0 }
 0x8ea   : > { %2805 = vst [vmem:[%s5654_s23] sm:$0xff] %v2215_v7  ;;  %v2262_v9 = vadd.f32 %v2215_v7, %v2215_v7 }
 0x8eb   : > { %v3720_v4 = vpop.f32.mrf.mxu0 }
 0x8ec   : > { %2808 = vst [vmem:[%s5654_s23 + $0x18] sm:$0xff] %v3720_v4  ;;  %v2265_v6 = vadd.f32 %v3720_v4, %v3720_v4 }
 0x8ed   : > { %v2218_v40 = vpop.f32.mrf.mxu0 }
 0x8ee   : > { %v2263_v11 = vadd.f32 %v2218_v40, %v2218_v40  ;;  %2806 = vst [vmem:[%s5654_s23 + $0x8] sm:$0xff] %v2218_v40  ;;  %v2271_v32 = vpack.c.bf16 %v2265_v6, %v2264_v8 }
 0x8f0   : > { %v2270_v10 = vpack.c.bf16 %v2263_v11, %v2262_v9 }
 0x8f2   : > { %3741 = vmatprep.mubr.bf16.mxu1 %v2270_v10 }
 0x8f3   : > { %3742 = vmatmul.mubr.bf16.vlgmr.msra.gmra.mxu1 %v2271_v32 }
 0x8f8   : > { %v3723_v14 = vpop.f32.mrf.mxu0 }
 0x8f9   : > { %2811 = vst [vmem:[%s5654_s23 + $0x30] sm:$0xff] %v3723_v14  ;;  %v2268_v35 = vadd.f32 %v3723_v14, %v3723_v14 }
 0x8fa   : > { %v2231_v61 = vpop.f32.mrf.mxu0 }
 0x8fb   : > { %2809 = vst [vmem:[%s5654_s23 + $0x20] sm:$0xff] %v2231_v61  ;;  %v2266_v60 = vadd.f32 %v2231_v61, %v2231_v61 }
 0x8fc   : > { %v3724_v58 = vpop.f32.mrf.mxu0 }
 0x8fd   : > { %2812 = vst [vmem:[%s5654_s23 + $0x38] sm:$0xff] %v3724_v58  ;;  %v2269_v41 = vadd.f32 %v3724_v58, %v3724_v58 }
 0x8fe   : > { %v2234_v43 = vpop.f32.mrf.mxu0 }
 0x8ff   : > { %v2267_v33 = vadd.f32 %v2234_v43, %v2234_v43  ;;  %2810 = vst [vmem:[%s5654_s23 + $0x28] sm:$0xff] %v2234_v43  ;;  %v2273_v51 = vpack.c.bf16 %v2269_v41, %v2268_v35  ;;  %s4879_s23 = scalar_lea.vmem %s4878_s12, 2048 }
 0x900   : > { %p4881_p1 = scmp.lt.s32.totalorder %s4879_s23, %s4873_s19 }
 0x901   : > { %v2272_v46 = vpack.c.bf16 %v2267_v33, %v2266_v60 }
 0x902   : > { %p4882_p3 = por %p4881_p1, %p4880_p5 }
 0x903   : > { %3745 = vmatprep.mubr.bf16.mxu1 %v2272_v46 }
 0x904   : > { %3746 = vmatmul.mubr.bf16.gmra.mxu1 %v2273_v51  ;;  %p4883_p4 = pnand %p4882_p3, %p4876_p13 }
 0x9b3   : > { %v3743_v37 = vpop.f32.mrf.mxu1 }
 0x9b4   : > { %v3353_v27 = vmul.f32 -1.442695, %v3743_v37  ;;  %v4539_v37 = vld [vmem:[#allocation10 + $0x74] ss:$8 sps:$4 sm:$0xff]  }
 0x9b5   : > { %v2356_v26 = vpop.f32.mrf.mxu1  ;;  %2732 = vmatprep.subr.bf16.mxu1 %v4539_v37 }
 0x9b6   : > { %4625 = vpow2.f32 %v3353_v27  ;;  %v3351_v2 = vmul.f32 -1.442695, %v2356_v26  ;;  %v4537_v27 = vld [vmem:[#allocation10 + $0x70] ss:$8 sps:$4 sm:$0xff]   ;;  %v4542_v26 = vld [vmem:[#allocation10 + $0x64] ss:$8 sps:$4 sm:$0xff]  }
 0x9b7   : > { %v3744_v1 = vpop.f32.mrf.mxu1  ;;  %2733 = vmatpush1.bf16.msra.mxu1 %v4537_v27 }
 0x9b8   : > { %4627 = vpow2.f32 %v3351_v2  ;;  %v3354_v0 = vmul.f32 -1.442695, %v3744_v1  ;;  %v4540_v2 = vld [vmem:[#allocation10 + $0x60] ss:$8 sps:$4 sm:$0xff]   ;;  %2734 = vmatprep.subr.bf16.mxu1 %v4542_v26  ;;  %v4545_v1 = vld [vmem:[#allocation10 + $0x54] ss:$8 sps:$4 sm:$0xff]  }
 0x9b9   : > { %v2359_v49 = vpop.f32.mrf.mxu1 }
 0x9ba   : > { %4629 = vpow2.f32 %v3354_v0  ;;  %v3352_v29 = vmul.f32 -1.442695, %v2359_v49  ;;  %v4549_v0 = vld [vmem:[#allocation10 + $0x30] ss:$8 sps:$4 sm:$0xff]   ;;  %v4554_v49 = vld [vmem:[#allocation10 + $0x24] ss:$8 sps:$4 sm:$0xff]  }
 0x9bb   : > { %2735 = vmatpush1.bf16.msra.mxu1 %v4540_v2 }
 0x9bc   : > { %4631 = vpow2.f32 %v3352_v29  ;;  %2736 = vmatprep.subr.bf16.mxu1 %v4545_v1  ;;  %v4552_v29 = vld [vmem:[#allocation10 + $0x20] ss:$8 sps:$4 sm:$0xff]  }
 0x9c3   : > { %v4626_v28 = vpop.eup %4625 }
 0x9c4   : > { %v2413_v59 = vadd.f32 1.0, %v4626_v28  ;;  %v3747_v63 = vpop.f32.mrf.mxu1  ;;  %v4557_v28 = vld [vmem:[#allocation10 + $0x14] ss:$8 sps:$4 sm:$0xff]  }
 0x9c5   : > { %v4628_v57 = vpop.eup %4627  ;;  %v3357_v25 = vmul.f32 -1.442695, %v3747_v63  ;;  %v4560_v63 = vld [vmem:[#allocation10 + $0x4] ss:$8 sps:$4 sm:$0xff]  }
 0x9c6   : > { %4633 = vrcp.f32 %v2413_v59  ;;  %v2411_v24 = vadd.f32 1.0, %v4628_v57  ;;  %v2372_v22 = vpop.f32.mrf.mxu1  ;;  %v4555_v59 = vld [vmem:[#allocation10 + $0x10] ss:$8 sps:$4 sm:$0xff]   ;;  %v4558_v57 = vld [vmem:[#allocation10] ss:$8 sps:$4 sm:$0xff]  }
 0x9c7   : > { %v4630_v21 = vpop.eup %4629  ;;  %4635 = vpow2.f32 %v3357_v25  ;;  %v3355_v16 = vmul.f32 -1.442695, %v2372_v22  ;;  %v5387_v25 = vmov 0  }
 0x9c8   : > { %4637 = vrcp.f32 %v2411_v24  ;;  %v2414_v19 = vadd.f32 1.0, %v4630_v21  ;;  %v3748_v18 = vpop.f32.mrf.mxu1  ;;  %2764 = vmatprep.mubr.bf16.mxu1 %v5387_v25 }
 0x9c9   : > { %v4632_v17 = vpop.eup %4631  ;;  %4639 = vpow2.f32 %v3355_v16  ;;  %v3358_v5 = vmul.f32 -1.442695, %v3748_v18 }
 0x9ca   : > { %4641 = vrcp.f32 %v2414_v19  ;;  %v2412_v7 = vadd.f32 1.0, %v4632_v17  ;;  %v2375_v4 = vpop.f32.mrf.mxu1 }
 0x9cb   : > { %4643 = vpow2.f32 %v3358_v5  ;;  %v3356_v6 = vmul.f32 -1.442695, %v2375_v4 }
 0x9cc   : > { %4645 = vrcp.f32 %v2412_v7 }
 0x9cd   : > { %4647 = vpow2.f32 %v3356_v6 }
 0x9d3   : > { %v4634_v40 = vpop.eup %4633 }
 0x9d4   : > { %v4636_v9 = vpop.eup %4635  ;;  %v2453_v51 = vadd.f32 %v4634_v40, %v6268_v48 }
 0x9d5   : > { %v4638_v11 = vpop.eup %4637  ;;  %v2417_v61 = vadd.f32 1.0, %v4636_v9 }
 0x9d6   : > { %v4640_v8 = vpop.eup %4639  ;;  %v2451_v33 = vadd.f32 %v4638_v11, %v6270_v42 }
 0x9d7   : > { %v4642_v10 = vpop.eup %4641  ;;  %v2415_v32 = vadd.f32 1.0, %v4640_v8 }
 0x9d8   : > { %v4644_v14 = vpop.eup %4643  ;;  %v2454_v43 = vadd.f32 %v4642_v10, %v6272_v20 }
 0x9d9   : > { %v4646_v58 = vpop.eup %4645  ;;  %v2418_v41 = vadd.f32 1.0, %v4644_v14  ;;  %4649 = vrcp.f32 %v2415_v32 }
 0x9da   : > { %v4648_v60 = vpop.eup %4647  ;;  %v2452_v35 = vadd.f32 %v4646_v58, %v6274_v52  ;;  %v2460_v31 = vpack.c.bf16 %v2454_v43, %v2453_v51 }
 0x9db   : > { %4651 = vrcp.f32 %v2418_v41  ;;  %v2416_v46 = vadd.f32 1.0, %v4648_v60 }
 0x9dc   : > { %4653 = vrcp.f32 %v2417_v61  ;;  %v2459_v23 = vpack.c.bf16 %v2452_v35, %v2451_v33 }
 0x9dd   : > { %4655 = vrcp.f32 %v2416_v46 }
 0x9de   : > { %3765 = vmatprep.mubr.bf16.mxu0 %v2459_v23 }
 0x9df   : > { %3766 = vmatmul.mubr.bf16.vlgmr.msra.gmra.mxu0 %v2460_v31 }
 0x9e6   : > { %v4650_v30 = vpop.eup %4649 }
 0x9e7   : > { %v2455_v42 = vadd.f32 %v4650_v30, %v6284_v50  ;;  %v4548_v50 = vld [vmem:[#allocation10 + $0x44] ss:$8 sps:$4 sm:$0xff]  }
 0x9e8   : > { %v4652_v53 = vpop.eup %4651 }
 0x9e9   : > { %v4654_v54 = vpop.eup %4653  ;;  %v2458_v3 = vadd.f32 %v4652_v53, %v6286_v62  ;;  %v4543_v62 = vld [vmem:[#allocation10 + $0x50] ss:$8 sps:$4 sm:$0xff]  }
 0x9ea   : > { %v4656_v20 = vpop.eup %4655  ;;  %v2457_v44 = vadd.f32 %v4654_v54, %v6288_v45  ;;  %2737 = vmatpush1.bf16.msra.mxu1 %v4543_v62  ;;  %v4551_v45 = vld [vmem:[#allocation10 + $0x34] ss:$8 sps:$4 sm:$0xff]  }
 0x9eb   : > { %v2456_v52 = vadd.f32 %v4656_v20, %v6290_v47  ;;  %v4546_v47 = vld [vmem:[#allocation10 + $0x40] ss:$8 sps:$4 sm:$0xff]   ;;  %2738 = vmatprep.subr.bf16.mxu1 %v4548_v50 }
 0x9ec   : > { %v2462_v48 = vpack.c.bf16 %v2458_v3, %v2457_v44 }
 0x9ed   : > { %v2461_v56 = vpack.c.bf16 %v2456_v52, %v2455_v42 }
 0x9ee   : > { %2739 = vmatpush1.bf16.msra.mxu1 %v4546_v47 }
 0x9ef   : > { %3769 = vmatprep.mubr.bf16.mxu0 %v2461_v56  ;;  %2740 = vmatprep.subr.bf16.mxu1 %v4551_v45 }
 0x9f0   : > { %3770 = vmatmul.mubr.bf16.gmra.mxu0 %v2462_v48 }
 0x9f2   : > { %2741 = vmatpush1.bf16.msra.mxu1 %v4549_v0 }
 0x9f3   : > { %2742 = vmatprep.subr.bf16.mxu1 %v4554_v49 }
 0x9f6   : > { %2743 = vmatpush1.bf16.msra.mxu1 %v4552_v29 }
 0x9f7   : > { %2744 = vmatprep.subr.bf16.mxu1 %v4557_v28 }
 0x9fa   : > { %2745 = vmatpush1.bf16.msra.mxu1 %v4555_v59 }
 0x9fb   : > { %2746 = vmatprep.subr.bf16.mxu1 %v4560_v63 }
 0x9fe   : > { %2747 = vmatpush1.bf16.msra.mxu1 %v4558_v57 }
 0xa9f   : > { %v3767_v24 = vpop.f32.mrf.mxu0 }
 0xaa0   : > { %v3369_v17 = vmul.f32 -1.442695, %v3767_v24 }
 0xaa1   : > { %v2545_v22 = vpop.f32.mrf.mxu0 }
 0xaa2   : > { %v3367_v21 = vmul.f32 -1.442695, %v2545_v22 }
 0xaa3   : > { %v3768_v16 = vpop.f32.mrf.mxu0 }
 0xaa4   : > { %4657 = vpow2.f32 %v3367_v21  ;;  %v3370_v19 = vmul.f32 -1.442695, %v3768_v16 }
 0xaa5   : > { %v2548_v18 = vpop.f32.mrf.mxu0 }
 0xaa6   : > { %v3368_v5 = vmul.f32 -1.442695, %v2548_v18  ;;  %4659 = vpow2.f32 %v3370_v19 }
 0xaa8   : > { %4661 = vpow2.f32 %v3368_v5 }
 0xaa9   : > { %4663 = vpow2.f32 %v3369_v17 }
 0xab0   : > { %v3771_v7 = vpop.f32.mrf.mxu0 }
 0xab1   : > { %v4658_v4 = vpop.eup %4657  ;;  %v3373_v41 = vmul.f32 -1.442695, %v3771_v7 }
 0xab2   : > { %v2600_v6 = vadd.f32 1.0, %v4658_v4  ;;  %v2561_v40 = vpop.f32.mrf.mxu0 }
 0xab3   : > { %v3371_v9 = vmul.f32 -1.442695, %v2561_v40  ;;  %v4660_v11 = vpop.eup %4659 }
 0xab4   : > { %v3772_v8 = vpop.f32.mrf.mxu0  ;;  %v2603_v60 = vadd.f32 1.0, %v4660_v11 }
 0xab5   : > { %v4662_v10 = vpop.eup %4661  ;;  %4665 = vpow2.f32 %v3371_v9  ;;  %v3374_v32 = vmul.f32 -1.442695, %v3772_v8 }
 0xab6   : > { %4667 = vrcp.f32 %v2600_v6  ;;  %v2601_v14 = vadd.f32 1.0, %v4662_v10  ;;  %v2564_v61 = vpop.f32.mrf.mxu0  ;;  %v4664_v58 = vpop.eup %4663 }
 0xab7   : > { %4669 = vpow2.f32 %v3374_v32  ;;  %v3372_v43 = vmul.f32 -1.442695, %v2564_v61  ;;  %v2602_v33 = vadd.f32 1.0, %v4664_v58 }
 0xab8   : > { %4671 = vrcp.f32 %v2601_v14 }
 0xab9   : > { %4673 = vpow2.f32 %v3372_v43 }
 0xaba   : > { %4675 = vpow2.f32 %v3373_v41 }
 0xabb   : > { %4677 = vrcp.f32 %v2603_v60 }
 0xabc   : > { %4679 = vrcp.f32 %v2602_v33 }
 0xac2   : > { %v4666_v35 = vpop.eup %4665 }
 0xac3   : > { %v4668_v46 = vpop.eup %4667  ;;  %v2604_v51 = vadd.f32 1.0, %v4666_v35 }
 0xac4   : > { %v4670_v23 = vpop.eup %4669  ;;  %v2640_v53 = vadd.f32 %v4668_v46, %v6236_v13 }
 0xac5   : > { %v4672_v31 = vpop.eup %4671  ;;  %4681 = vrcp.f32 %v2604_v51  ;;  %v2607_v44 = vadd.f32 1.0, %v4670_v23 }
 0xac6   : > { %v4674_v30 = vpop.eup %4673  ;;  %v2641_v54 = vadd.f32 %v4672_v31, %v6238_v12 }
 0xac7   : > { %v2605_v20 = vadd.f32 1.0, %v4674_v30  ;;  %v4676_v3 = vpop.eup %4675 }
 0xac8   : > { %v2648_v42 = vpack.c.bf16 %v2641_v54, %v2640_v53  ;;  %v4678_v52 = vpop.eup %4677  ;;  %v2606_v48 = vadd.f32 1.0, %v4676_v3 }
 0xac9   : > { %4683 = vrcp.f32 %v2605_v20  ;;  %v4680_v56 = vpop.eup %4679  ;;  %v2643_v37 = vadd.f32 %v4678_v52, %v6246_v38 }
 0xaca   : > { %2765 = vmatmul.mubr.bf16.vlgmr.msra.gmra.mxu1 %v2648_v42  ;;  %4685 = vrcp.f32 %v2607_v44  ;;  %v2642_v27 = vadd.f32 %v4680_v56, %v6244_v34 }
 0xacb   : > { %2774 = vmatprep.mubr.bf16.mxu1 %v5387_v25  ;;  %4687 = vrcp.f32 %v2606_v48 }
 0xacc   : > { %v2649_v13 = vpack.c.bf16 %v2643_v37, %v2642_v27 }
 0xad2   : > { %2775 = vmatmul.mubr.bf16.gmra.mxu1 %v2649_v13  ;;  %v4682_v12 = vpop.eup %4681 }
 0xad3   : > { %2784 = vmatprep.mubr.bf16.mxu1 %v5387_v25  ;;  %v2644_v2 = vadd.f32 %v4682_v12, %v6252_v36 }
 0xad6   : > { %v4684_v26 = vpop.eup %4683 }
 0xad7   : > { %v2645_v1 = vadd.f32 %v4684_v26, %v6254_v15  ;;  %v4686_v38 = vpop.eup %4685 }
 0xad8   : > { %v4688_v50 = vpop.eup %4687  ;;  %v2647_v34 = vadd.f32 %v4686_v38, %v6262_v55 }
 0xad9   : > { %v2650_v62 = vpack.c.bf16 %v2645_v1, %v2644_v2  ;;  %v2646_v47 = vadd.f32 %v4688_v50, %v6260_v39 }
 0xadb   : > { %2785 = vmatmul.mubr.bf16.gmra.mxu1 %v2650_v62  ;;  %v2651_v45 = vpack.c.bf16 %v2647_v34, %v2646_v47 }
 0xadc   : > { %2794 = vmatprep.mubr.bf16.mxu1 %v5387_v25 }
 0xae3   : > { %2795 = vmatmul.mubr.bf16.gmra.mxu1 %v2651_v45 }
 0xae4   : > { %4886 = shalt.err (!%p4883_p4)
}
 0xae5   : > { %s4887_s15 = scalar_lea.hbm %s6333_s16, 1024  ;;  %s4891_s26 = scalar_lea.hbm %s6434_s8, 2048 }
 0xae6   : > { %p4888_p6 = scmp.ne.s32.totalorder %s6333_s16, %s4887_s15  ;;  %p4892_p7 = scmp.lt.s32.totalorder %s6333_s16, %s6434_s8 }
 0xae7   : > { %p4893_p2 = scmp.lt.s32.totalorder %s4891_s26, %s4887_s15 }
 0xae8   : > { %p4889_p12 = pnand %p4888_p6, %p6624_p10 }
 0xae9   : > { %p4894_p9 = por %p4893_p2, %p4892_p7 }
 0xaea   : > { %p4890_p0 = pneg %p4889_p12 }
 0xaec   : > { %p4895_p8 = pnand %p4894_p9, %p4890_p0 }
 0xaee   : > { %4898 = shalt.err (!%p4895_p8)
}
 0xaef   : > { %s5389_s19 = smov 128   ;;  %s5390_s22 = smov 8  }
 0xaf0   : > { %3800 = dma.vmem_to_hbm [thread:$0]  (%p6624_p10), %s6335_s21, 1024, %s6333_s16, %s2835_s2, %s5389_s19, %s5389_s19, %s5390_s22  }
 0xaf1   : > { %s3403_s21 = sshll.u32 %s5460_s11, 11  ;;  %s2849_s16 = sshll.u32 %s5652_s20, 4  ;;  %s6381_s16 = int_to_ptr.vmem [resolvable:$true] %s2849_s16 }
 0xaf2   : > { %s6379_s23 = scalar_lea.hbm %s6433_s7, %s3403_s21  ;;  %s2830_s15 = scalar_lea.sflag [#allocation4], %s5629_s13 }
 0xaf3   : > { %s4899_s17 = scalar_lea.vmem %s6381_s16, 2048  ;;  %s5391_s11 = smov [#allocation14]  }
 0xaf4   : > { %p4900_p11 = scmp.ne.s32.totalorder %s6381_s16, %s4899_s17  ;;  %s4903_s24 = sshll.u32 %s5391_s11, 4  ;;  %s4904_s24 = int_to_ptr.vmem [resolvable:$false] %s4903_s24 }
 0xaf5   : > { %s4905_s26 = scalar_lea.vmem %s4904_s24, 4096  ;;  %p4906_p1 = scmp.lt.s32.totalorder %s6381_s16, %s4904_s24 }
 0xaf6   : > { %p4901_p13 = pnand %p4900_p11, %p6624_p10  ;;  %p4907_p3 = scmp.lt.s32.totalorder %s4905_s26, %s4899_s17 }
 0xaf8   : > { %p4902_p5 = pneg %p4901_p13  ;;  %p4908_p4 = por %p4907_p3, %p4906_p1 }
 0xafa   : > { %p4909_p6 = pnand %p4908_p4, %p4902_p5 }
 0xb8a   : > { %v2766_v36 = vpop.f32.mrf.mxu1 }
 0xb8b   : > { %2813 = vst [vmem:[%s5652_s20] sm:$0xff] %v2766_v36 }
 0xb8c   : > { %v2768_v15 = vpop.f32.mrf.mxu1 }
 0xb8d   : > { %2814 = vst [vmem:[%s5652_s20 + $0x8] sm:$0xff] %v2768_v15 }
 0xb8e   : > { %v2770_v39 = vpop.f32.mrf.mxu1 }
 0xb8f   : > { %2815 = vst [vmem:[%s5652_s20 + $0x10] sm:$0xff] %v2770_v39 }
 0xb90   : > { %v2772_v55 = vpop.f32.mrf.mxu1 }
 0xb91   : > { %2816 = vst [vmem:[%s5652_s20 + $0x18] sm:$0xff] %v2772_v55 }
 0xb92   : > { %v2776_v0 = vpop.f32.mrf.mxu1 }
 0xb93   : > { %2817 = vst [vmem:[%s5652_s20 + $0x20] sm:$0xff] %v2776_v0 }
 0xb94   : > { %v2778_v49 = vpop.f32.mrf.mxu1 }
 0xb95   : > { %2818 = vst [vmem:[%s5652_s20 + $0x28] sm:$0xff] %v2778_v49 }
 0xb96   : > { %v2780_v29 = vpop.f32.mrf.mxu1 }
 0xb97   : > { %2819 = vst [vmem:[%s5652_s20 + $0x30] sm:$0xff] %v2780_v29 }
 0xb98   : > { %v2782_v28 = vpop.f32.mrf.mxu1 }
 0xb99   : > { %2820 = vst [vmem:[%s5652_s20 + $0x38] sm:$0xff] %v2782_v28 }
 0xb9b   : > { %v2786_v59 = vpop.f32.mrf.mxu1 }
 0xb9c   : > { %2821 = vst [vmem:[%s5652_s20 + $0x40] sm:$0xff] %v2786_v59 }
 0xb9d   : > { %v2788_v63 = vpop.f32.mrf.mxu1 }
 0xb9e   : > { %2822 = vst [vmem:[%s5652_s20 + $0x48] sm:$0xff] %v2788_v63 }
 0xb9f   : > { %v2790_v57 = vpop.f32.mrf.mxu1 }
 0xba0   : > { %2823 = vst [vmem:[%s5652_s20 + $0x50] sm:$0xff] %v2790_v57 }
 0xba1   : > { %v2792_v25 = vpop.f32.mrf.mxu1 }
 0xba2   : > { %2824 = vst [vmem:[%s5652_s20 + $0x58] sm:$0xff] %v2792_v25 }
 0xba3   : > { %v2796_v24 = vpop.f32.mrf.mxu1 }
 0xba4   : > { %2825 = vst [vmem:[%s5652_s20 + $0x60] sm:$0xff] %v2796_v24 }
 0xba5   : > { %v2798_v22 = vpop.f32.mrf.mxu1 }
 0xba6   : > { %2826 = vst [vmem:[%s5652_s20 + $0x68] sm:$0xff] %v2798_v22 }
 0xba7   : > { %v2800_v21 = vpop.f32.mrf.mxu1 }
 0xba8   : > { %2827 = vst [vmem:[%s5652_s20 + $0x70] sm:$0xff] %v2800_v21 }
 0xba9   : > { %v2802_v16 = vpop.f32.mrf.mxu1 }
 0xbaa   : > { %2828 = vst [vmem:[%s5652_s20 + $0x78] sm:$0xff] %v2802_v16 }
 0xbab   : > { %4912 = shalt.err (!%p4909_p6)
}
 0xbac   : > { %s4913_s20 = scalar_lea.hbm %s6379_s23, 2048  ;;  %s4917_s19 = scalar_lea.hbm %s6433_s7, 4096 }
 0xbad   : > { %p4914_p12 = scmp.ne.s32.totalorder %s6379_s23, %s4913_s20  ;;  %p4918_p2 = scmp.lt.s32.totalorder %s6379_s23, %s6433_s7 }
 0xbae   : > { %p4919_p9 = scmp.lt.s32.totalorder %s4917_s19, %s4913_s20 }
 0xbaf   : > { %p4915_p0 = pnand %p4914_p12, %p6624_p10 }
 0xbb0   : > { %p4920_p8 = por %p4919_p9, %p4918_p2 }
 0xbb1   : > { %p4916_p7 = pneg %p4915_p0 }
 0xbb3   : > { %p4921_p11 = pnand %p4920_p8, %p4916_p7 }
 0xbb5   : > { %4924 = shalt.err (!%p4921_p11)
}
 0xbb6   : > { %s5392_s2 = smov 256   ;;  %s5393_s12 = smov 16  }
 0xbb7   : > { %3799 = dma.vmem_to_hbm [thread:$0]  (%p6624_p10), %s6381_s16, 2048, %s6379_s23, %s2830_s15, %s5392_s2, %s5392_s2, %s5393_s12  }
 0xbb8 PF: > { %s2880_s17 = sand.u32 1, %s5163_s27   ;;  %p6625_p13 = scmp.ne.s32.totalorder %s6476_s10, 0 }
 0xbb9   : > { %p6626_p5 = scmp.ge.s32.totalorder %s5175_s30, 2  ;;  %s2881_s11 = scalar_lea.sflag [#allocation4], %s2880_s17 }
 0xbbb   : > { %p3827_p1 = pnand %p6626_p5, %p6625_p13 }
 0xbbd   : > { %p3828_p3 = pneg %p3827_p1 }
 0xbbf   : > { %5154 = dma.done.wait (%p3828_p3), %s2881_s11, 2048  }
 0xbc0   : > { %5156 = vsyncadd (%p3828_p3), %s2881_s11, 4294965248  ;;  %s2890_s24 = scalar_lea.sflag [#allocation16], %s2880_s17 }
 0xbc1   : > { %5158 = dma.done.wait (%p3828_p3), %s2890_s24, 1024  }
 0xbc2   : > { %5160 = vsyncadd (%p3828_p3), %s2890_s24, 4294966272  ;;  %p28_p10 = scmp.ge.s32.totalorder %s5557_s18, 4   ;;  %s6627_s27 = smov %s5167_s28 }
 0xbc3   : > { %s6628_s28 = smov %s5171_s29  ;;  %s6629_s29 = smov %s5568_s25 }
 0xbc4   : > { %s6630_s30 = smov %s5557_s18  ;;  %30 = sbr.rel (!%p28_p10) target bundleno = 13 (0xd), region = 152 }
 0xbc9   :  { %2895 = vsyncpa [#allocation3], 1 }
 0xbca   :  { %2897 = vsyncpa [#allocation3 + $0x1], 1 }
 0xbcb   :  { %2898 = vsyncpa [#allocation6], 1 }
 0xbcc   :  { %2899 = vsyncpa [#allocation9], 1 }
 0xbcd   :  { %2900 = vsyncpa [#allocation12], 1 }
 0xbce   :  { %2901 = vsyncpa [#allocation4], 1 }
 0xbcf   :  { %2903 = vsyncpa [#allocation4 + $0x1], 1 }
 0xbd0   :  { %2904 = vsyncpa [#allocation16], 1 }
 0xbd1   :  { %2906 = vsyncpa [#allocation16 + $0x1], 1 }

</bundles_post_ra>
